<compile_context>
chip_gen: v5e
topology: v5e:2x2
jax: 0.10.0
libtpu: 0.0.40
codegen_flags: <defaults>
</compile_context>

<pallas_src>
import functools

import jax
import jax.numpy as jnp
from jax import lax
from jax.experimental import pallas as pl
from jax.experimental.pallas import tpu as pltpu

BN_EPS = 1e-5
LANES = 128
SUBLANES = 8


def conv_block(x_nchw, weight, bias, gamma, beta, *, stride=1, padding=1,
               tile_h=None, compute_dtype=jnp.float32,
               vmem_limit_bytes=32 * 1024 * 1024):
    """ConvBlock forward.  x_nchw: (N, C_in, H, W); weight: (C_out, C_in, KH, KW)."""
    N, Cin, H, W = x_nchw.shape
    Cout, Cin_w, KH, KW = weight.shape
    assert Cin_w == Cin
    # TODO(synk): generalize the body/halo row tiling to stride > 1.
    assert stride == 1, "only stride=1 implemented"
    # TODO(synk): 1xK kernels need no halo; route them through a plain tiled matmul.
    assert KH >= 2, "KH >= 2 required by the halo tiling"

    Ho = (H + 2 * padding - KH) // stride + 1
    Wo = (W + 2 * padding - KW) // stride + 1
    Hp = H + 2 * padding
    Wp = W + 2 * padding
    M = N * Ho * Wo
    Cpad = ((Cout + LANES - 1) // LANES) * LANES
    f32 = jnp.float32

    # ---- pick an output-row tile (largest that keeps the y tile small & aligned) ----
    if tile_h is None:
        cands = [c for c in range(1, Ho + 1)
                 if Ho % c == 0 and c % (KH - 1) == 0 and (c * Wo) % SUBLANES == 0]
        assert cands, "no valid output-row tile for these shapes"
        fitting = [c for c in cands if c * Wo * Cpad * 4 <= 2 * 1024 * 1024]
        tile_h = max(fitting) if fitting else min(cands)
    assert Ho % tile_h == 0
    assert tile_h % (KH - 1) == 0, "halo alignment requires (KH-1) | tile_h"
    assert (tile_h * Wo) % SUBLANES == 0
    T = Ho // tile_h                     # output-row tiles per image
    NT = N * T
    rows = tile_h * Wo                   # output rows (M) per grid step
    HALO = KH - 1

    # ---- glue: NCHW -> padded NHWC (no im2col in HBM) -------------------------------
    x_nhwc = jnp.transpose(x_nchw, (0, 2, 3, 1))
    x_pad = jnp.pad(x_nhwc, ((0, 0), (padding, padding), (padding, padding), (0, 0)))
    x_pad = x_pad.astype(compute_dtype)                       # (N, Hp, Wp, Cin)

    # weight as (KH*KW, Cin, Cpad): kernel picks w_ref[kh*KW+kw] -> (Cin, Cpad)
    w_r = jnp.transpose(weight, (2, 3, 1, 0)).reshape(KH * KW, Cin, Cout)
    w_r = jnp.pad(w_r, ((0, 0), (0, 0), (0, Cpad - Cout))).astype(compute_dtype)
    b_pad = jnp.pad(bias.astype(f32), (0, Cpad - Cout)).reshape(1, Cpad)
    g_pad = jnp.pad(gamma.astype(f32), (0, Cpad - Cout))       # pad channels -> scale 0
    be_pad = jnp.pad(beta.astype(f32), (0, Cpad - Cout))

    # ---- pass 1: conv (shifted matmuls) + bias + partial BN stats --------------------
    def conv_stats_kernel(xb_ref, xh_ref, w_ref, b_ref, y_ref, s_ref):
        xb = xb_ref[0]                                          # (tile_h, Wp, Cin)
        xh = xh_ref[0]                                          # (KH-1, Wp, Cin)
        xall = jnp.concatenate([xb, xh], axis=0)                # (tile_h+KH-1, Wp, Cin)
        acc = jnp.zeros((rows, Cpad), f32)
        for kh in range(KH):
            for kw in range(KW):
                xs = xall[kh:kh + tile_h, kw:kw + Wo, :]        # (tile_h, Wo, Cin)
                xs2 = xs.reshape(rows, Cin)                     # lane dim unchanged
                acc = acc + jnp.dot(xs2, w_ref[kh * KW + kw],
                                    preferred_element_type=f32)
        y = acc + b_ref[...]                                    # conv bias
        y_ref[...] = y
        # fused per-tile partial BatchNorm statistics (combined globally outside)
        ssum = jnp.sum(y, axis=0, keepdims=True)                # (1, Cpad)
        ssq = jnp.sum(y * y, axis=0, keepdims=True)             # (1, Cpad)
        part = jnp.concatenate([ssum, ssq], axis=1)             # (1, 2*Cpad)
        s_ref[...] = jnp.broadcast_to(part.reshape(1, 1, 2 * Cpad),
                                      (1, SUBLANES, 2 * Cpad))

    cost1 = pl.CostEstimate(
        flops=2 * M * (Cin * KH * KW) * Cpad,
        transcendentals=0,
        bytes_accessed=(x_pad.size * x_pad.dtype.itemsize
                        + w_r.size * w_r.dtype.itemsize
                        + M * Cpad * 4 + NT * SUBLANES * 2 * Cpad * 4))

    y2d, stats = pl.pallas_call(
        conv_stats_kernel,
        out_shape=(jax.ShapeDtypeStruct((M, Cpad), f32),
                   jax.ShapeDtypeStruct((NT, SUBLANES, 2 * Cpad), f32)),
        grid=(N, T),
        in_specs=[
            # body rows [t*tile_h, (t+1)*tile_h)
            pl.BlockSpec((1, tile_h, Wp, Cin), lambda n, t: (n, t, 0, 0)),
            # halo rows [(t+1)*tile_h, (t+1)*tile_h + KH-1)   (same array, second view)
            pl.BlockSpec((1, HALO, Wp, Cin),
                         lambda n, t: (n, (t + 1) * (tile_h // HALO), 0, 0)),
            pl.BlockSpec((KH * KW, Cin, Cpad), lambda n, t: (0, 0, 0)),   # resident
            pl.BlockSpec((1, Cpad), lambda n, t: (0, 0)),                 # resident
        ],
        out_specs=(
            pl.BlockSpec((rows, Cpad), lambda n, t: (n * T + t, 0)),
            pl.BlockSpec((1, SUBLANES, 2 * Cpad), lambda n, t: (n * T + t, 0, 0)),
        ),
        compiler_params=pltpu.CompilerParams(
            dimension_semantics=("parallel", "parallel"),
            vmem_limit_bytes=vmem_limit_bytes),
        cost_estimate=cost1,
    )(x_pad, x_pad, w_r, b_pad)

    # ---- tiny JAX combine: global BN stats -> folded per-channel scale / shift ------
    part = stats[:, 0, :]                                       # (NT, 2*Cpad)
    total = jnp.sum(part, axis=0)                               # (2*Cpad,)
    ssum, ssq = total[:Cpad], total[Cpad:]
    mean = ssum / M
    var = jnp.maximum(ssq / M - mean * mean, 0.0)               # biased var (BN training)
    scale = g_pad * lax.rsqrt(var + BN_EPS)
    shift = be_pad - mean * scale
    ss = jnp.stack([scale, shift], axis=0)                      # packed (2, Cpad)

    # ---- pass 2: y * scale + shift, ReLU  (fully parallel, lane-dense) ---------------
    def norm_relu_kernel(y_ref, ss_ref, o_ref):
        o_ref[...] = jnp.maximum(y_ref[...] * ss_ref[0:1, :] + ss_ref[1:2, :],
                                 0.0).astype(o_ref.dtype)

    out2d = pl.pallas_call(
        norm_relu_kernel,
        out_shape=jax.ShapeDtypeStruct((M, Cpad), x_nchw.dtype),
        grid=(NT,),
        in_specs=[pl.BlockSpec((rows, Cpad), lambda i: (i, 0)),
                  pl.BlockSpec((2, Cpad), lambda i: (0, 0))],
        out_specs=pl.BlockSpec((rows, Cpad), lambda i: (i, 0)),
        compiler_params=pltpu.CompilerParams(
            dimension_semantics=("parallel",),
            vmem_limit_bytes=vmem_limit_bytes),
    )(y2d, ss)

    # ---- glue: drop channel padding, back to NCHW -----------------------------------
    out = out2d[:, :Cout].reshape(N, Ho, Wo, Cout)
    return jnp.transpose(out, (0, 3, 1, 2))


def reference(x_nchw, weight, bias, gamma, beta, *, stride=1, padding=1):
    y = lax.conv_general_dilated(
        x_nchw.astype(jnp.float32), weight.astype(jnp.float32),
        window_strides=(stride, stride), padding=[(padding, padding)] * 2,
        dimension_numbers=("NCHW", "OIHW", "NCHW"))
    y = y + bias.reshape(1, -1, 1, 1)
    mean = jnp.mean(y, axis=(0, 2, 3), keepdims=True)
    var = jnp.mean(jnp.square(y - mean), axis=(0, 2, 3), keepdims=True)
    y = (y - mean) * lax.rsqrt(var + BN_EPS)
    y = y * gamma.reshape(1, -1, 1, 1) + beta.reshape(1, -1, 1, 1)
    return jnp.maximum(y, 0.0)


if __name__ == "__main__":
    # ConvBlock(in_channels=4, out_channels=8, kernel_size=3, stride=1, padding=1)
    N, Cin, H, W = 2, 4, 16, 16
    Cout, KH, KW = 8, 3, 3

    key = jax.random.PRNGKey(0)
    kx, kw_, kb = jax.random.split(key, 3)
    x = jax.random.normal(kx, (N, Cin, H, W), dtype=jnp.float32)
    fan_in = Cin * KH * KW
    bound = 1.0 / (fan_in ** 0.5)
    weight = jax.random.uniform(kw_, (Cout, Cin, KH, KW), jnp.float32, -bound, bound)
    bias = jax.random.uniform(kb, (Cout,), jnp.float32, -bound, bound)
    gamma = jnp.ones((Cout,), jnp.float32)
    beta = jnp.zeros((Cout,), jnp.float32)

    # tile_h=8 -> grid (N=2, T=2): exercises the multi-tile path with global BN stats.
    fwd = jax.jit(functools.partial(conv_block, stride=1, padding=1, tile_h=8))
    out = jax.block_until_ready(fwd(x, weight, bias, gamma, beta))

    ref = reference(x, weight, bias, gamma, beta, stride=1, padding=1)
    assert out.shape == (N, Cout, H, W), out.shape
    assert jnp.allclose(out, ref, rtol=1e-2, atol=1e-2), float(jnp.max(jnp.abs(out - ref)))

    print("KERNEL_OK")
</pallas_src>

<mosaic_0001>
module attributes {stable_mosaic.version = 11 : i64} {
  func.func @norm_relu_kernel(%arg0: i32, %arg1: memref<128x128xf32, #tpu.memory_space<vmem>>, %arg2: memref<2x128xf32, #tpu.memory_space<vmem>>, %arg3: memref<128x128xf32, #tpu.memory_space<vmem>>) attributes {dimension_semantics = [#tpu.dimension_semantics<parallel>], iteration_bounds = array<i64: 4>, scalar_prefetch = 0 : i64, scratch_operands = 0 : i64, tpu.core_type = #tpu.core_type<tc>, window_params = [{transform_indices = @transform_0, window_bounds = array<i64: 128, 128>}, {pipeline_mode = #tpu.pipeline_mode<synchronous>, transform_indices = @transform_1, window_bounds = array<i64: 2, 128>}, {transform_indices = @transform_2, window_bounds = array<i64: 128, 128>}]} {
    %c0 = arith.constant 0 : index
    %c0_0 = arith.constant 0 : index
    %0 = vector.load %arg1[%c0, %c0_0] : memref<128x128xf32, #tpu.memory_space<vmem>>, vector<128x128xf32>
    %c0_1 = arith.constant 0 : index
    %c0_2 = arith.constant 0 : index
    %1 = vector.load %arg2[%c0_1, %c0_2] : memref<2x128xf32, #tpu.memory_space<vmem>>, vector<1x128xf32>
    %2 = vector.broadcast %1 : vector<1x128xf32> to vector<128x128xf32>
    %3 = arith.mulf %0, %2 : vector<128x128xf32>
    %c1 = arith.constant 1 : index
    %c0_3 = arith.constant 0 : index
    %4 = vector.load %arg2[%c1, %c0_3] : memref<2x128xf32, #tpu.memory_space<vmem>>, vector<1x128xf32>
    %5 = vector.broadcast %4 : vector<1x128xf32> to vector<128x128xf32>
    %6 = arith.addf %3, %5 : vector<128x128xf32>
    %cst = arith.constant 0.000000e+00 : f32
    %7 = vector.broadcast %cst : f32 to vector<128x128xf32>
    %8 = arith.maximumf %6, %7 : vector<128x128xf32>
    %c0_4 = arith.constant 0 : index
    %c0_5 = arith.constant 0 : index
    %9 = vector.load %arg3[%c0_4, %c0_5] : memref<128x128xf32, #tpu.memory_space<vmem>>, vector<128x128xf32>
    tpu.vector_store %arg3[%c0_4, %c0_5], %8 {strides = array<i32>} : memref<128x128xf32, #tpu.memory_space<vmem>>, vector<128x128xf32>,
    return
  }
  func.func @transform_0(%arg0: i32) -> (i32, i32) {
    %c0_i32 = arith.constant 0 : i32
    %c0_i32_0 = arith.constant 0 : i32
    return %arg0, %c0_i32 : i32, i32
  }
  func.func @transform_1(%arg0: i32) -> (i32, i32) {
    %c0_i32 = arith.constant 0 : i32
    %c0_i32_0 = arith.constant 0 : i32
    %c0_i32_1 = arith.constant 0 : i32
    return %c0_i32, %c0_i32_0 : i32, i32
  }
  func.func @transform_2(%arg0: i32) -> (i32, i32) {
    %c0_i32 = arith.constant 0 : i32
    %c0_i32_0 = arith.constant 0 : i32
    return %arg0, %c0_i32 : i32, i32
  }
}

module attributes {stable_mosaic.version = 11 : i64} {
  func.func @conv_stats_kernel(%arg0: i32, %arg1: i32, %arg2: memref<1x8x18x4xf32, #tpu.memory_space<vmem>>, %arg3: memref<1x2x18x4xf32, #tpu.memory_space<vmem>>, %arg4: memref<9x4x128xf32, #tpu.memory_space<vmem>>, %arg5: memref<1x128xf32, #tpu.memory_space<vmem>>, %arg6: memref<128x128xf32, #tpu.memory_space<vmem>>, %arg7: memref<1x8x256xf32, #tpu.memory_space<vmem>>) attributes {dimension_semantics = [#tpu.dimension_semantics<parallel>, #tpu.dimension_semantics<parallel>], iteration_bounds = array<i64: 2, 2>, scalar_prefetch = 0 : i64, scratch_operands = 0 : i64, tpu.core_type = #tpu.core_type<tc>, window_params = [{transform_indices = @transform_0, window_bounds = array<i64: 1, 8, 18, 4>}, {transform_indices = @transform_1, window_bounds = array<i64: 1, 2, 18, 4>}, {pipeline_mode = #tpu.pipeline_mode<synchronous>, transform_indices = @transform_2, window_bounds = array<i64: 9, 4, 128>}, {pipeline_mode = #tpu.pipeline_mode<synchronous>, transform_indices = @transform_3, window_bounds = array<i64: 1, 128>}, {transform_indices = @transform_4, window_bounds = array<i64: 128, 128>}, {transform_indices = @transform_5, window_bounds = array<i64: 1, 8, 256>}]} {
    %c0 = arith.constant 0 : index
    %c0_0 = arith.constant 0 : index
    %c0_1 = arith.constant 0 : index
    %c0_2 = arith.constant 0 : index
    %0 = vector.load %arg2[%c0, %c0_0, %c0_1, %c0_2] : memref<1x8x18x4xf32, #tpu.memory_space<vmem>>, vector<1x8x18x4xf32>
    %1 = vector.shape_cast %0 : vector<1x8x18x4xf32> to vector<8x18x4xf32>
    %c0_3 = arith.constant 0 : index
    %c0_4 = arith.constant 0 : index
    %c0_5 = arith.constant 0 : index
    %c0_6 = arith.constant 0 : index
    %2 = vector.load %arg3[%c0_3, %c0_4, %c0_5, %c0_6] : memref<1x2x18x4xf32, #tpu.memory_space<vmem>>, vector<1x2x18x4xf32>
    %3 = vector.shape_cast %2 : vector<1x2x18x4xf32> to vector<2x18x4xf32>
    %4 = tpu.concatenate %1, %3 in 0 : vector<8x18x4xf32>, vector<2x18x4xf32> -> vector<10x18x4xf32>
    %cst = arith.constant 0.000000e+00 : f32
    %5 = vector.broadcast %cst : f32 to vector<128x128xf32>
    %6 = vector.extract_strided_slice %4 {offsets = [0, 0, 0], sizes = [8, 16, 4], strides = [1, 1, 1]} : vector<10x18x4xf32> to vector<8x16x4xf32>
    %7 = vector.shape_cast %6 : vector<8x16x4xf32> to vector<128x4xf32>
    %c0_7 = arith.constant 0 : index
    %c0_8 = arith.constant 0 : index
    %c0_9 = arith.constant 0 : index
    %8 = vector.load %arg4[%c0_7, %c0_8, %c0_9] : memref<9x4x128xf32, #tpu.memory_space<vmem>>, vector<1x4x128xf32>
    %9 = vector.shape_cast %8 : vector<1x4x128xf32> to vector<4x128xf32>
    %cst_10 = arith.constant dense<0.000000e+00> : vector<128x128xf32>
    %10 = tpu.matmul %7, %9, %cst_10 {dimension_numbers = #tpu.dot_dimension_numbers<[1], [0], [0], [1], [0, 0, 1, 1], [], []>} : vector<128x4xf32>, vector<4x128xf32>, vector<128x128xf32> -> vector<128x128xf32>
    %11 = arith.addf %5, %10 : vector<128x128xf32>
    %12 = vector.extract_strided_slice %4 {offsets = [0, 1, 0], sizes = [8, 16, 4], strides = [1, 1, 1]} : vector<10x18x4xf32> to vector<8x16x4xf32>
    %13 = vector.shape_cast %12 : vector<8x16x4xf32> to vector<128x4xf32>
    %c1 = arith.constant 1 : index
    %c0_11 = arith.constant 0 : index
    %c0_12 = arith.constant 0 : index
    %14 = vector.load %arg4[%c1, %c0_11, %c0_12] : memref<9x4x128xf32, #tpu.memory_space<vmem>>, vector<1x4x128xf32>
    %15 = vector.shape_cast %14 : vector<1x4x128xf32> to vector<4x128xf32>
    %cst_13 = arith.constant dense<0.000000e+00> : vector<128x128xf32>
    %16 = tpu.matmul %13, %15, %cst_13 {dimension_numbers = #tpu.dot_dimension_numbers<[1], [0], [0], [1], [0, 0, 1, 1], [], []>} : vector<128x4xf32>, vector<4x128xf32>, vector<128x128xf32> -> vector<128x128xf32>
    %17 = arith.addf %11, %16 : vector<128x128xf32>
    %18 = vector.extract_strided_slice %4 {offsets = [0, 2, 0], sizes = [8, 16, 4], strides = [1, 1, 1]} : vector<10x18x4xf32> to vector<8x16x4xf32>
    %19 = vector.shape_cast %18 : vector<8x16x4xf32> to vector<128x4xf32>
    %c2 = arith.constant 2 : index
    %c0_14 = arith.constant 0 : index
    %c0_15 = arith.constant 0 : index
    %20 = vector.load %arg4[%c2, %c0_14, %c0_15] : memref<9x4x128xf32, #tpu.memory_space<vmem>>, vector<1x4x128xf32>
    %21 = vector.shape_cast %20 : vector<1x4x128xf32> to vector<4x128xf32>
    %cst_16 = arith.constant dense<0.000000e+00> : vector<128x128xf32>
    %22 = tpu.matmul %19, %21, %cst_16 {dimension_numbers = #tpu.dot_dimension_numbers<[1], [0], [0], [1], [0, 0, 1, 1], [], []>} : vector<128x4xf32>, vector<4x128xf32>, vector<128x128xf32> -> vector<128x128xf32>
    %23 = arith.addf %17, %22 : vector<128x128xf32>
    %24 = vector.extract_strided_slice %4 {offsets = [1, 0, 0], sizes = [8, 16, 4], strides = [1, 1, 1]} : vector<10x18x4xf32> to vector<8x16x4xf32>
    %25 = vector.shape_cast %24 : vector<8x16x4xf32> to vector<128x4xf32>
    %c3 = arith.constant 3 : index
    %c0_17 = arith.constant 0 : index
    %c0_18 = arith.constant 0 : index
    %26 = vector.load %arg4[%c3, %c0_17, %c0_18] : memref<9x4x128xf32, #tpu.memory_space<vmem>>, vector<1x4x128xf32>
    %27 = vector.shape_cast %26 : vector<1x4x128xf32> to vector<4x128xf32>
    %cst_19 = arith.constant dense<0.000000e+00> : vector<128x128xf32>
    %28 = tpu.matmul %25, %27, %cst_19 {dimension_numbers = #tpu.dot_dimension_numbers<[1], [0], [0], [1], [0, 0, 1, 1], [], []>} : vector<128x4xf32>, vector<4x128xf32>, vector<128x128xf32> -> vector<128x128xf32>
    %29 = arith.addf %23, %28 : vector<128x128xf32>
    %30 = vector.extract_strided_slice %4 {offsets = [1, 1, 0], sizes = [8, 16, 4], strides = [1, 1, 1]} : vector<10x18x4xf32> to vector<8x16x4xf32>
    %31 = vector.shape_cast %30 : vector<8x16x4xf32> to vector<128x4xf32>
    %c4 = arith.constant 4 : index
    %c0_20 = arith.constant 0 : index
    %c0_21 = arith.constant 0 : index
    %32 = vector.load %arg4[%c4, %c0_20, %c0_21] : memref<9x4x128xf32, #tpu.memory_space<vmem>>, vector<1x4x128xf32>
    %33 = vector.shape_cast %32 : vector<1x4x128xf32> to vector<4x128xf32>
    %cst_22 = arith.constant dense<0.000000e+00> : vector<128x128xf32>
    %34 = tpu.matmul %31, %33, %cst_22 {dimension_numbers = #tpu.dot_dimension_numbers<[1], [0], [0], [1], [0, 0, 1, 1], [], []>} : vector<128x4xf32>, vector<4x128xf32>, vector<128x128xf32> -> vector<128x128xf32>
    %35 = arith.addf %29, %34 : vector<128x128xf32>
    %36 = vector.extract_strided_slice %4 {offsets = [1, 2, 0], sizes = [8, 16, 4], strides = [1, 1, 1]} : vector<10x18x4xf32> to vector<8x16x4xf32>
    %37 = vector.shape_cast %36 : vector<8x16x4xf32> to vector<128x4xf32>
    %c5 = arith.constant 5 : index
    %c0_23 = arith.constant 0 : index
    %c0_24 = arith.constant 0 : index
    %38 = vector.load %arg4[%c5, %c0_23, %c0_24] : memref<9x4x128xf32, #tpu.memory_space<vmem>>, vector<1x4x128xf32>
    %39 = vector.shape_cast %38 : vector<1x4x128xf32> to vector<4x128xf32>
    %cst_25 = arith.constant dense<0.000000e+00> : vector<128x128xf32>
    %40 = tpu.matmul %37, %39, %cst_25 {dimension_numbers = #tpu.dot_dimension_numbers<[1], [0], [0], [1], [0, 0, 1, 1], [], []>} : vector<128x4xf32>, vector<4x128xf32>, vector<128x128xf32> -> vector<128x128xf32>
    %41 = arith.addf %35, %40 : vector<128x128xf32>
    %42 = vector.extract_strided_slice %4 {offsets = [2, 0, 0], sizes = [8, 16, 4], strides = [1, 1, 1]} : vector<10x18x4xf32> to vector<8x16x4xf32>
    %43 = vector.shape_cast %42 : vector<8x16x4xf32> to vector<128x4xf32>
    %c6 = arith.constant 6 : index
    %c0_26 = arith.constant 0 : index
    %c0_27 = arith.constant 0 : index
    %44 = vector.load %arg4[%c6, %c0_26, %c0_27] : memref<9x4x128xf32, #tpu.memory_space<vmem>>, vector<1x4x128xf32>
    %45 = vector.shape_cast %44 : vector<1x4x128xf32> to vector<4x128xf32>
    %cst_28 = arith.constant dense<0.000000e+00> : vector<128x128xf32>
    %46 = tpu.matmul %43, %45, %cst_28 {dimension_numbers = #tpu.dot_dimension_numbers<[1], [0], [0], [1], [0, 0, 1, 1], [], []>} : vector<128x4xf32>, vector<4x128xf32>, vector<128x128xf32> -> vector<128x128xf32>
    %47 = arith.addf %41, %46 : vector<128x128xf32>
    %48 = vector.extract_strided_slice %4 {offsets = [2, 1, 0], sizes = [8, 16, 4], strides = [1, 1, 1]} : vector<10x18x4xf32> to vector<8x16x4xf32>
    %49 = vector.shape_cast %48 : vector<8x16x4xf32> to vector<128x4xf32>
    %c7 = arith.constant 7 : index
    %c0_29 = arith.constant 0 : index
    %c0_30 = arith.constant 0 : index
    %50 = vector.load %arg4[%c7, %c0_29, %c0_30] : memref<9x4x128xf32, #tpu.memory_space<vmem>>, vector<1x4x128xf32>
    %51 = vector.shape_cast %50 : vector<1x4x128xf32> to vector<4x128xf32>
    %cst_31 = arith.constant dense<0.000000e+00> : vector<128x128xf32>
    %52 = tpu.matmul %49, %51, %cst_31 {dimension_numbers = #tpu.dot_dimension_numbers<[1], [0], [0], [1], [0, 0, 1, 1], [], []>} : vector<128x4xf32>, vector<4x128xf32>, vector<128x128xf32> -> vector<128x128xf32>
    %53 = arith.addf %47, %52 : vector<128x128xf32>
    %54 = vector.extract_strided_slice %4 {offsets = [2, 2, 0], sizes = [8, 16, 4], strides = [1, 1, 1]} : vector<10x18x4xf32> to vector<8x16x4xf32>
    %55 = vector.shape_cast %54 : vector<8x16x4xf32> to vector<128x4xf32>
    %c8 = arith.constant 8 : index
    %c0_32 = arith.constant 0 : index
    %c0_33 = arith.constant 0 : index
    %56 = vector.load %arg4[%c8, %c0_32, %c0_33] : memref<9x4x128xf32, #tpu.memory_space<vmem>>, vector<1x4x128xf32>
    %57 = vector.shape_cast %56 : vector<1x4x128xf32> to vector<4x128xf32>
    %cst_34 = arith.constant dense<0.000000e+00> : vector<128x128xf32>
    %58 = tpu.matmul %55, %57, %cst_34 {dimension_numbers = #tpu.dot_dimension_numbers<[1], [0], [0], [1], [0, 0, 1, 1], [], []>} : vector<128x4xf32>, vector<4x128xf32>, vector<128x128xf32> -> vector<128x128xf32>
    %59 = arith.addf %53, %58 : vector<128x128xf32>
    %c0_35 = arith.constant 0 : index
    %c0_36 = arith.constant 0 : index
    %60 = vector.load %arg5[%c0_35, %c0_36] : memref<1x128xf32, #tpu.memory_space<vmem>>, vector<1x128xf32>
    %61 = vector.broadcast %60 : vector<1x128xf32> to vector<128x128xf32>
    %62 = arith.addf %59, %61 : vector<128x128xf32>
    %c0_37 = arith.constant 0 : index
    %c0_38 = arith.constant 0 : index
    %63 = vector.load %arg6[%c0_37, %c0_38] : memref<128x128xf32, #tpu.memory_space<vmem>>, vector<128x128xf32>
    tpu.vector_store %arg6[%c0_37, %c0_38], %62 {strides = array<i32>} : memref<128x128xf32, #tpu.memory_space<vmem>>, vector<128x128xf32>,
    %cst_39 = arith.constant dense<0.000000e+00> : vector<128xf32>
    %64 = vector.multi_reduction <add>, %62, %cst_39 [0] : vector<128x128xf32> to vector<128xf32>
    %65 = vector.shape_cast %64 : vector<128xf32> to vector<1x128xf32>
    %66 = arith.mulf %62, %62 : vector<128x128xf32>
    %cst_40 = arith.constant dense<0.000000e+00> : vector<128xf32>
    %67 = vector.multi_reduction <add>, %66, %cst_40 [0] : vector<128x128xf32> to vector<128xf32>
    %68 = vector.shape_cast %67 : vector<128xf32> to vector<1x128xf32>
    %69 = tpu.concatenate %65, %68 in 1 : vector<1x128xf32>, vector<1x128xf32> -> vector<1x256xf32>
    %70 = vector.shape_cast %69 : vector<1x256xf32> to vector<1x1x256xf32>
    %71 = vector.shape_cast %70 : vector<1x1x256xf32> to vector<1x1x256xf32>
    %72 = vector.broadcast %71 : vector<1x1x256xf32> to vector<1x8x256xf32>
    %c0_41 = arith.constant 0 : index
    %c0_42 = arith.constant 0 : index
    %c0_43 = arith.constant 0 : index
    %73 = vector.load %arg7[%c0_41, %c0_42, %c0_43] : memref<1x8x256xf32, #tpu.memory_space<vmem>>, vector<1x8x256xf32>
    tpu.vector_store %arg7[%c0_41, %c0_42, %c0_43], %72 {strides = array<i32>} : memref<1x8x256xf32, #tpu.memory_space<vmem>>, vector<1x8x256xf32>,
    return
  }
  func.func @transform_0(%arg0: i32, %arg1: i32) -> (i32, i32, i32, i32) {
    %c0_i32 = arith.constant 0 : i32
    %c0_i32_0 = arith.constant 0 : i32
    %c0_i32_1 = arith.constant 0 : i32
    return %arg0, %arg1, %c0_i32, %c0_i32_0 : i32, i32, i32, i32
  }
  func.func @transform_1(%arg0: i32, %arg1: i32) -> (i32, i32, i32, i32) {
    %c1_i32 = arith.constant 1 : i32
    %0 = arith.addi %arg1, %c1_i32 : i32
    %c4_i32 = arith.constant 4 : i32
    %1 = arith.muli %0, %c4_i32 : i32
    %c0_i32 = arith.constant 0 : i32
    %c0_i32_0 = arith.constant 0 : i32
    %c0_i32_1 = arith.constant 0 : i32
    return %arg0, %1, %c0_i32, %c0_i32_0 : i32, i32, i32, i32
  }
  func.func @transform_2(%arg0: i32, %arg1: i32) -> (i32, i32, i32) {
    %c0_i32 = arith.constant 0 : i32
    %c0_i32_0 = arith.constant 0 : i32
    %c0_i32_1 = arith.constant 0 : i32
    %c0_i32_2 = arith.constant 0 : i32
    return %c0_i32, %c0_i32_0, %c0_i32_1 : i32, i32, i32
  }
  func.func @transform_3(%arg0: i32, %arg1: i32) -> (i32, i32) {
    %c0_i32 = arith.constant 0 : i32
    %c0_i32_0 = arith.constant 0 : i32
    %c0_i32_1 = arith.constant 0 : i32
    return %c0_i32, %c0_i32_0 : i32, i32
  }
  func.func @transform_4(%arg0: i32, %arg1: i32) -> (i32, i32) {
    %c2_i32 = arith.constant 2 : i32
    %0 = arith.muli %arg0, %c2_i32 : i32
    %1 = arith.addi %0, %arg1 : i32
    %c0_i32 = arith.constant 0 : i32
    %c0_i32_0 = arith.constant 0 : i32
    return %1, %c0_i32 : i32, i32
  }
  func.func @transform_5(%arg0: i32, %arg1: i32) -> (i32, i32, i32) {
    %c2_i32 = arith.constant 2 : i32
    %0 = arith.muli %arg0, %c2_i32 : i32
    %1 = arith.addi %0, %arg1 : i32
    %c0_i32 = arith.constant 0 : i32
    %c0_i32_0 = arith.constant 0 : i32
    %c0_i32_1 = arith.constant 0 : i32
    return %1, %c0_i32, %c0_i32_0 : i32, i32, i32
  }
}

</mosaic_0001>

<bundles_post_ra>
// kernel: conv_block.3
= control target key start
LH: loop header
LB: loop body
LE: loop exit
PB: predicated region body
PF: predicated region fallthrough
CT: control target
= control target key end

     0   :  { %s331_s9 = smov 0   ;;  %s408_s0 = inlined_call_operand.vmem [shape: f32[512,128], index: 0, kind: input, shape index: {}]   ;;  %s409_s1 = inlined_call_operand.vmem [shape: f32[2,128], index: 1, kind: input, shape index: {}]   ;;  %s410_s2 = inlined_call_operand.vmem [shape: f32[512,128], index: 2, kind: output, shape index: {}]  }
   0x1 LB: > { %s287_s10 = sadd.s32 4294967295, %s314_s9   ;;  %p291_p0 = scmp.ge.s32.totalorder %s314_s9, 1  ;;  %s314_s9 = sphi %s331_s9, %s12_s9  }
   0x2   : > { %p113_p1 = scmp.lt.s32.totalorder %s314_s9, 5 }
   0x4   : > { %p114_p2 = pnand %p291_p0, %p113_p1 }
   0x5   : > { %s292_s11 = sshll.u32 (!%p114_p2), %s287_s10, 4 }
   0x6   : > { %117 = sbr.rel (%p114_p2) target bundleno = 37 (0x25), region = 28  ;;  %p136_p3 = scmp.lt.s32.totalorder (!%p114_p2), %s292_s11, 63 }
   0xb   : > { %s412_s11 = smov (!%p136_p3, %s292_s11), 63  ;;  %v306_v0 = vld [vmem:[%s409_s1] ss:$0 sm:$0xff]  ;;  %v350_v1 = vld [vmem:[%s409_s1 + $0x1] ss:$0 sm:$0xff] }
   0xc   : > { %s293_s14 = sshll.u32 %s412_s11, 3 }
   0xd   : > { %s345_s17 = scalar_lea.vmem %s408_s0, %s293_s14  ;;  %s366_s22 = scalar_lea.vmem %s410_s2, %s293_s14 }
   0xe   : > { %v147_v2 = vld [vmem:[%s345_s17] sm:$0xff]  ;;  %v148_v3 = vld [vmem:[%s345_s17 + $0x8] sm:$0xff]  ;;  %v149_v4 = vld [vmem:[%s345_s17 + $0x10] sm:$0xff] }
   0xf   : > { %v165_v5 = vmul.f32 %v306_v0, %v147_v2  ;;  %v166_v6 = vmul.f32 %v306_v0, %v148_v3  ;;  %v167_v7 = vmul.f32 %v306_v0, %v149_v4  ;;  %v150_v8 = vld [vmem:[%s345_s17 + $0x18] sm:$0xff]  ;;  %v151_v9 = vld [vmem:[%s345_s17 + $0x20] sm:$0xff]  ;;  %v152_v10 = vld [vmem:[%s345_s17 + $0x28] sm:$0xff] }
  0x10   : > { %v168_v11 = vmul.f32 %v306_v0, %v150_v8  ;;  %v169_v12 = vmul.f32 %v306_v0, %v151_v9  ;;  %v170_v13 = vmul.f32 %v306_v0, %v152_v10  ;;  %v153_v14 = vld [vmem:[%s345_s17 + $0x30] sm:$0xff]  ;;  %v154_v15 = vld [vmem:[%s345_s17 + $0x38] sm:$0xff]  ;;  %v155_v24 = vld [vmem:[%s345_s17 + $0x40] sm:$0xff] }
  0x11   : > { %v183_v16 = vadd.f32 %v350_v1, %v165_v5  ;;  %v184_v17 = vadd.f32 %v350_v1, %v166_v6  ;;  %v185_v18 = vadd.f32 %v350_v1, %v167_v7  ;;  %v171_v19 = vmul.f32 %v306_v0, %v153_v14  ;;  %v156_v25 = vld [vmem:[%s345_s17 + $0x48] sm:$0xff]  ;;  %v157_v26 = vld [vmem:[%s345_s17 + $0x50] sm:$0xff]  ;;  %v158_v31 = vld [vmem:[%s345_s17 + $0x58] sm:$0xff] }
  0x12   : > { %v186_v20 = vadd.f32 %v350_v1, %v168_v11  ;;  %v187_v21 = vadd.f32 %v350_v1, %v169_v12  ;;  %v188_v22 = vadd.f32 %v350_v1, %v170_v13  ;;  %v172_v23 = vmul.f32 %v306_v0, %v154_v15  ;;  %v159_v32 = vld [vmem:[%s345_s17 + $0x60] sm:$0xff]  ;;  %v160_v33 = vld [vmem:[%s345_s17 + $0x68] sm:$0xff]  ;;  %v161_v37 = vld [vmem:[%s345_s17 + $0x70] sm:$0xff] }
  0x13   : > { %v199_v27 = vmax.f32 %v183_v16, 0.0  ;;  %v200_v28 = vmax.f32 %v184_v17, 0.0  ;;  %v201_v29 = vmax.f32 %v185_v18, 0.0  ;;  %v189_v30 = vadd.f32 %v350_v1, %v171_v19  ;;  %v162_v42 = vld [vmem:[%s345_s17 + $0x78] sm:$0xff] }
  0x14   : > { %v202_v34 = vmax.f32 %v186_v20, 0.0  ;;  %v203_v35 = vmax.f32 %v187_v21, 0.0  ;;  %v190_v36 = vadd.f32 %v350_v1, %v172_v23  ;;  %v204_v38 = vmax.f32 %v188_v22, 0.0 }
  0x15   : > { %215 = vst [vmem:[%s366_s22] sm:$0xff] %v199_v27  ;;  %v173_v39 = vmul.f32 %v306_v0, %v155_v24  ;;  %v174_v40 = vmul.f32 %v306_v0, %v156_v25  ;;  %v175_v41 = vmul.f32 %v306_v0, %v157_v26  ;;  %v205_v43 = vmax.f32 %v189_v30, 0.0 }
  0x16   : > { %216 = vst [vmem:[%s366_s22 + $0x8] sm:$0xff] %v200_v28  ;;  %v176_v44 = vmul.f32 %v306_v0, %v158_v31  ;;  %v177_v45 = vmul.f32 %v306_v0, %v159_v32  ;;  %v178_v46 = vmul.f32 %v306_v0, %v160_v33  ;;  %v179_v50 = vmul.f32 %v306_v0, %v161_v37 }
  0x17   : > { %217 = vst [vmem:[%s366_s22 + $0x10] sm:$0xff] %v201_v29  ;;  %v191_v47 = vadd.f32 %v350_v1, %v173_v39  ;;  %v192_v48 = vadd.f32 %v350_v1, %v174_v40  ;;  %v193_v49 = vadd.f32 %v350_v1, %v175_v41  ;;  %v206_v51 = vmax.f32 %v190_v36, 0.0 }
  0x18   : > { %218 = vst [vmem:[%s366_s22 + $0x18] sm:$0xff] %v202_v34  ;;  %v194_v52 = vadd.f32 %v350_v1, %v176_v44  ;;  %v180_v53 = vmul.f32 %v306_v0, %v162_v42  ;;  %v195_v55 = vadd.f32 %v350_v1, %v177_v45  ;;  %v196_v57 = vadd.f32 %v350_v1, %v178_v46 }
  0x19   : > { %219 = vst [vmem:[%s366_s22 + $0x20] sm:$0xff] %v203_v35  ;;  %v207_v54 = vmax.f32 %v191_v47, 0.0  ;;  %v208_v56 = vmax.f32 %v192_v48, 0.0  ;;  %v209_v58 = vmax.f32 %v193_v49, 0.0  ;;  %v197_v59 = vadd.f32 %v350_v1, %v179_v50 }
  0x1a   : > { %220 = vst [vmem:[%s366_s22 + $0x28] sm:$0xff] %v204_v38  ;;  %v210_v60 = vmax.f32 %v194_v52, 0.0  ;;  %v198_v61 = vadd.f32 %v350_v1, %v180_v53  ;;  %v211_v62 = vmax.f32 %v195_v55, 0.0  ;;  %v212_v63 = vmax.f32 %v196_v57, 0.0 }
  0x1b   : > { %221 = vst [vmem:[%s366_s22 + $0x30] sm:$0xff] %v205_v43  ;;  %v213_v0 = vmax.f32 %v197_v59, 0.0 }
  0x1c   : > { %222 = vst [vmem:[%s366_s22 + $0x38] sm:$0xff] %v206_v51  ;;  %v214_v2 = vmax.f32 %v198_v61, 0.0 }
  0x1d   : > { %223 = vst [vmem:[%s366_s22 + $0x40] sm:$0xff] %v207_v54 }
  0x1e   : > { %224 = vst [vmem:[%s366_s22 + $0x48] sm:$0xff] %v208_v56 }
  0x1f   : > { %225 = vst [vmem:[%s366_s22 + $0x50] sm:$0xff] %v209_v58 }
  0x20   : > { %226 = vst [vmem:[%s366_s22 + $0x58] sm:$0xff] %v210_v60 }
  0x21   : > { %227 = vst [vmem:[%s366_s22 + $0x60] sm:$0xff] %v211_v62 }
  0x22   : > { %228 = vst [vmem:[%s366_s22 + $0x68] sm:$0xff] %v212_v63 }
  0x23   : > { %229 = vst [vmem:[%s366_s22 + $0x70] sm:$0xff] %v213_v0 }
  0x24   : > { %230 = vst [vmem:[%s366_s22 + $0x78] sm:$0xff] %v214_v2 }
  0x25 PF: > { %s12_s9 = sadd.s32 1, %s314_s9  }
  0x26   : > { %p9_p4 = scmp.ge.s32.totalorder %s12_s9, 6  }
  0x28   :  { %11 = sbr.rel (!%p9_p4) target bundleno = 1 (0x1), region = 58 }

// kernel: conv_block.2
= control target key start
LH: loop header
LB: loop body
LE: loop exit
PB: predicated region body
PF: predicated region fallthrough
CT: control target
= control target key end

     0   :  { %s1946_s18 = smov 0   ;;  %s1948_s19 = smov 0   ;;  %s2692_s0 = inlined_call_operand.vmem [shape: f32[2,18,18,4], index: 0, kind: input, shape index: {}, may-alias: {0,1}]   ;;  %s2693_s1 = inlined_call_operand.vmem [shape: f32[2,18,18,4], index: 1, kind: input, shape index: {}, may-alias: {0,1}]   ;;  %s2694_s2 = inlined_call_operand.vmem [shape: f32[9,4,128], index: 2, kind: input, shape index: {}]   ;;  %s2695_s3 = inlined_call_operand.vmem [shape: f32[1,128], index: 3, kind: input, shape index: {}]   ;;  %s2696_s4 = inlined_call_operand.vmem [shape: f32[512,128], index: 4, kind: output, shape index: {0}]   ;;  %s2697_s5 = inlined_call_operand.vmem [shape: f32[4,8,256], index: 5, kind: output, shape index: {1}]  }
   0x1   :  { %s1950_s20 = smov 0   ;;  %s1952_s21 = smov 0  }
   0x2   :  { %s1954_s22 = smov 0  }
   0x3 LB: > { %s25_s23 = sadd.s32 1, %s1906_s20  ;;  %s28_s24 = sadd.s32 1, %s1910_s21  ;;  %s1914_s22 = sphi %s1954_s22, %s16_s22   ;;  %s1910_s21 = sphi %s1952_s21, %s2710_s21   ;;  %s1906_s20 = sphi %s1950_s20, %s2709_s20   ;;  %s1902_s19 = sphi %s1948_s19, %s2708_s19   ;;  %s1898_s18 = sphi %s1946_s18, %s2707_s18  }
   0x4   : > { %p26_p0 = scmp.ge.s32.totalorder %s25_s23, 2  ;;  %p1644_p1 = scmp.ge.s32.totalorder %s1914_s22, 1 }
   0x5   : > { %p254_p2 = scmp.lt.s32.totalorder %s1914_s22, 5 }
   0x6   : > { %s2712_s23 = smov (%p26_p0, %s25_s23), 0  ;;  %s2714_s24 = smov (!%p26_p0, %s28_s24), %s1910_s21 }
   0x7   : > { %p255_p3 = pnand %p1644_p1, %p254_p2  ;;  %p30_p4 = scmp.ge.s32.totalorder %s2714_s24, 2 }
   0x9   : > { %s2716_s24 = smov (%p30_p4, %s2714_s24), 0  ;;  %258 = sbr.rel (%p255_p3) target bundleno = 468 (0x1d4), region = 36 }
   0xe   : > { %v1656_v0 = vld [vmem:[%s2694_s2 + $0x4] sm:$0xf]  ;;  %vm499_vm0 = vcmask 1043456   ;;  %s1984_s27 = sshll.u32 %s1898_s18, 3  ;;  %p319_p5 = scmp.lt.s32.totalorder %s1902_s19, 1  ;;  %vm423_vm1 = vcmask 1046528  }
   0xf   : > { %1829 = vmatpush.msk.msra.mxu1 %vm499_vm0, %v1656_v0  ;;  %1830 = vmatpush.msk.msra.mxu2 %vm499_vm0, %v1656_v0  ;;  %p321_p6 = scmp.lt.s32.totalorder %s1984_s27, 17  ;;  %v1691_v1 = vld [vmem:[%s2694_s2 + $0x8] sm:$0xf]  ;;  %v1709_v2 = vld [vmem:[%s2694_s2 + $0xc] sm:$0xf]  ;;  %vm466_vm2 = vcmask 31744  }
  0x10   : > { %s1997_s7 = scalar_select %p319_p5, %s1902_s19, 1  ;;  %1831 = vmatpush.msk.msra.mxu3 %vm499_vm0, %v1656_v0  ;;  %v398_v3 = vld [vmem:[%s2694_s2] sm:$0xf]  ;;  %v1727_v4 = vld [vmem:[%s2694_s2 + $0x10] sm:$0xf]  ;;  %1657 = vmatpush.msk.msra.mxu0 %vm499_vm0, %v1656_v0  ;;  %vm668_vm3 = vcmask 1045504  }
  0x11   : > { %1692 = vmatpush.msk.msrb.mxu2 %vm499_vm0, %v1691_v1  ;;  %s322_s12 = scalar_select %p321_p6, %s1984_s27, 17  ;;  %1674 = vmatpush.msk.msrb.mxu1 %vm499_vm0, %v398_v3  ;;  %v1763_v36 = vld [vmem:[%s2694_s2 + $0x18] sm:$0xf]  ;;  %v1781_v41 = vld [vmem:[%s2694_s2 + $0x1c] sm:$0xf] }
  0x12   : > { %1710 = vmatpush.msk.msrb.mxu3 %vm499_vm0, %v1709_v2  ;;  %s1833_s13 = smul.u32 54, %s1997_s7  ;;  %1728 = vmatpush.msk.msrb.mxu0 %vm499_vm0, %v1727_v4  ;;  %v1745_v44 = vld [vmem:[%s2694_s2 + $0x14] sm:$0xf]  ;;  %s1828_s10 = sadd.s32 8, %s1984_s27  ;;  %v1799_v50 = vld [vmem:[%s2694_s2 + $0x20] sm:$0xf] }
  0x13   : > { %s1832_s14 = smul.u32 3, %s322_s12  ;;  %p339_p7 = scmp.lt.s32.totalorder %s1828_s10, 17 }
  0x14   : > { %s1650_s17 = sshll.u32 %s1902_s19, 1 }
  0x15   : > { %s325_s15 = sadd.s32 %s1833_s13, %s1832_s14  ;;  %s2718_s10 = smov (!%p339_p7, %s1828_s10), 17 }
  0x16   : > { %s1646_s16 = sshll.u32 %s325_s15, 3  ;;  %s1834_s27 = smul.u32 3, %s2718_s10 }
  0x17   : > { %s2018_s26 = scalar_lea.vmem %s2692_s0, %s1646_s16  ;;  %s2607_s25 = sadd.s32 %s1898_s18, %s1650_s17 }
  0x18   : > { %v2021_v5 = vld [vmem:[%s2018_s26 + $0x30] sm:$0xff]  ;;  %v2024_v6 = vld [vmem:[%s2018_s26 + $0x38] sm:$0xff]  ;;  %v2027_v7 = vld [vmem:[%s2018_s26 + $0x60] sm:$0xff]  ;;  %s2168_s14 = sadd.s32 %s1834_s27, %s1833_s13  ;;  %s1651_s19 = sshll.u32 %s2607_s25, 4 }
  0x19   : > { %v434_v8 = vrot.slane %v2021_v5, 1  ;;  %v435_v9 = vrot.slane %v2024_v6, 1  ;;  %v2032_v10 = vld [vmem:[%s2018_s26 + $0x68] sm:$0xff]  ;;  %v444_v11 = vrot.slane %v2027_v7, 1  ;;  %v2036_v12 = vld [vmem:[%s2018_s26 + $0x90] sm:$0xff]  ;;  %v2039_v13 = vld [vmem:[%s2018_s26 + $0x98] sm:$0xff] }
  0x1a   : > { %v445_v14 = vrot.slane %v2032_v10, 1  ;;  %v454_v15 = vrot.slane %v2036_v12, 1  ;;  %v455_v16 = vrot.slane %v2039_v13, 1  ;;  %v2045_v17 = vld [vmem:[%s2018_s26 + $0x40] sm:$0x3]  ;;  %v2057_v21 = vld [vmem:[%s2018_s26 + $0x8] sm:$0xff] }
  0x1b   : > { %v2048_v18 = vld [vmem:[%s2018_s26] sm:$0xff]  ;;  %v2051_v19 = vsel %vm423_vm1, %v434_v8, %v435_v9  ;;  %v2054_v20 = vld [vmem:[%s2018_s26 + $0x70] sm:$0x3]  ;;  %v425_v25 = vrot.slane %v2057_v21, 1  ;;  %v437_v27 = vrot.slane %v2045_v17, 1  ;;  %v2089_v34 = vld [vmem:[%s2018_s26 + $0x48] sm:$0xff] }
  0x1c   : > { %v424_v22 = vrot.slane %v2048_v18, 1  ;;  %1662 = vmatmul.msk.f32.vlgmr.msra.gmra.mxu1 %vm466_vm2, %v2051_v19  ;;  %v2063_v23 = vsel %vm423_vm1, %v444_v11, %v445_v14  ;;  %v2066_v24 = vsel %vm423_vm1, %v454_v15, %v455_v16  ;;  %v2070_v26 = vld [vmem:[%s2018_s26 + $0xa0] sm:$0x3]  ;;  %v2078_v28 = vld [vmem:[%s2018_s26 + $0x10] sm:$0x3]  ;;  %v447_v29 = vrot.slane %v2054_v20, 1 }
  0x1d   : > { %1666 = vmatmul.msk.f32.vlgmr.msra.gmra.mxu2 %vm466_vm2, %v2063_v23  ;;  %1670 = vmatmul.msk.f32.vlgmr.msra.gmra.mxu3 %vm466_vm2, %v2066_v24  ;;  %v457_v31 = vrot.slane %v2070_v26, 1  ;;  %v427_v32 = vrot.slane %v2078_v28, 1  ;;  %v2086_v33 = vsel %vm423_vm1, %v435_v9, %v437_v27  ;;  %v2092_v35 = vld [vmem:[%s2018_s26 + $0x50] sm:$0xff]  ;;  %v2104_v39 = vld [vmem:[%s2018_s26 + $0x78] sm:$0xff]  ;;  %v2107_v40 = vld [vmem:[%s2018_s26 + $0x80] sm:$0xff]  ;;  %v439_v45 = vrot.slane %v2089_v34, 1 }
  0x1e   : > { %v426_v30 = vsel %vm423_vm1, %v424_v22, %v425_v25  ;;  %v2098_v37 = vsel %vm423_vm1, %v445_v14, %v447_v29  ;;  %1764 = vmatpush.msk.msra.mxu2 %vm499_vm0, %v1763_v36  ;;  %v2114_v42 = vld [vmem:[%s2018_s26 + $0xa8] sm:$0xff]  ;;  %v2117_v43 = vld [vmem:[%s2018_s26 + $0xb0] sm:$0xff]  ;;  %1782 = vmatpush.msk.msra.mxu3 %vm499_vm0, %v1781_v41  ;;  %v440_v47 = vrot.slane %v2092_v35, 1  ;;  %v371_v48 = vld [vmem:[%s2018_s26 + $0x18] sm:$0xff]  ;;  %v449_v51 = vrot.slane %v2104_v39, 1  ;;  %s1649_s7 = sshll.u32 %s2168_s14, 3 }
  0x1f   : > { %1658 = vmatmul.msk.f32.vlgmr.msra.gmra.mxu0 %vm466_vm2, %v426_v30  ;;  %v2101_v38 = vsel %vm423_vm1, %v455_v16, %v457_v31  ;;  %v428_v46 = vsel %vm423_vm1, %v425_v25, %v427_v32  ;;  %v2135_v49 = vld [vmem:[%s2018_s26 + $0x20] sm:$0xff]  ;;  %v450_v52 = vrot.slane %v2107_v40, 1  ;;  %v459_v53 = vrot.slane %v2114_v42, 1  ;;  %1746 = vmatpush.msk.msra.mxu1 %vm499_vm0, %v1745_v44  ;;  %v2158_v60 = vld [vmem:[%s2018_s26 + $0x58] sm:$0x3]  ;;  %s2368_s16 = scalar_lea.vmem %s2693_s1, %s1649_s7  ;;  %p352_p8 = scmp.lt.s32.totalorder %s1651_s19, 63 }
  0x20   : > { %v460_v54 = vrot.slane %v2117_v43, 1  ;;  %1800 = vmatpush.msk.msra.mxu0 %vm499_vm0, %v1799_v50  ;;  %v429_v55 = vrot.slane %v371_v48, 1  ;;  %v430_v56 = vrot.slane %v2135_v49, 1  ;;  %v2149_v57 = vsel %vm423_vm1, %v439_v45, %v440_v47  ;;  %v2161_v61 = vld [vmem:[%s2018_s26 + $0x88] sm:$0x3]  ;;  %p361_p9 = scmp.lt.s32.totalorder %s2607_s25, 3 }
  0x21   : > { %v2152_v58 = vsel %vm423_vm1, %v449_v51, %v450_v52  ;;  %v2164_v62 = vld [vmem:[%s2018_s26 + $0xb8] sm:$0x3]  ;;  %v442_v0 = vrot.slane %v2158_v60, 1  ;;  %v373_v1 = vld [vmem:[%s2018_s26 + $0x28] sm:$0x3]  ;;  %v452_v2 = vrot.slane %v2161_v61, 1 }
  0x22   : > { %v2155_v59 = vsel %vm423_vm1, %v459_v53, %v460_v54  ;;  %v431_v63 = vsel %vm423_vm1, %v429_v55, %v430_v56  ;;  %v462_v3 = vrot.slane %v2164_v62, 1  ;;  %v432_v4 = vrot.slane %v373_v1, 1  ;;  %s2720_s19 = smov (!%p352_p8, %s1651_s19), 63  ;;  %s2722_s25 = smov (!%p361_p9, %s2607_s25), 3 }
  0x23   : > { %v2183_v8 = vsel %vm423_vm1, %v440_v47, %v442_v0  ;;  %v2186_v9 = vsel %vm423_vm1, %v450_v52, %v452_v2  ;;  %v669_v15 = vrot.slane %v2048_v18, 2  ;;  %v670_v16 = vrot.slane %v2057_v21, 2  ;;  %s1652_s18 = sshll.u32 %s2720_s19, 3  ;;  %s1826_s8 = sshll.u32 %s2722_s25, 4 }
  0x24   : > { %1663 = vmatmul.msk.f32.gmra.mxu1 %vm466_vm2, %v2086_v33  ;;  %v2189_v11 = vsel %vm423_vm1, %v460_v54, %v462_v3  ;;  %v433_v14 = vsel %vm423_vm1, %v430_v56, %v432_v4  ;;  %v672_v25 = vrot.slane %v2078_v28, 2  ;;  %v674_v29 = vrot.slane %v371_v48, 2  ;;  %s2623_s6 = scalar_lea.vmem %s2696_s4, %s1652_s18  ;;  %s365_s11 = scalar_lea.vmem %s2697_s5, %s1826_s8 }
  0x25   : > { %1667 = vmatmul.msk.f32.gmra.mxu2 %vm466_vm2, %v2098_v37  ;;  %1671 = vmatmul.msk.f32.gmra.mxu3 %vm466_vm2, %v2101_v38  ;;  %v671_v22 = vsel %vm668_vm3, %v669_v15, %v670_v16  ;;  %v679_v31 = vrot.slane %v2021_v5, 2  ;;  %v680_v32 = vrot.slane %v2024_v6, 2  ;;  %v682_v41 = vrot.slane %v2045_v17, 2 }
  0x26   : > { %v673_v27 = vsel %vm668_vm3, %v670_v16, %v672_v25  ;;  %v684_v45 = vrot.slane %v2089_v34, 2  ;;  %v687_v47 = vrot.slane %v2158_v60, 2  ;;  %v690_v50 = vrot.slane %v2032_v10, 2 }
  0x27   : > { %1659 = vmatmul.msk.f32.gmra.mxu0 %vm466_vm2, %v428_v46  ;;  %v2240_v36 = vsel %vm668_vm3, %v679_v31, %v680_v32  ;;  %v2252_v44 = vsel %vm668_vm3, %v680_v32, %v682_v41  ;;  %v685_v46 = vrot.slane %v2092_v35, 2  ;;  %v692_v52 = vrot.slane %v2054_v20, 2 }
  0x28   : > { %v694_v54 = vrot.slane %v2104_v39, 2  ;;  %v695_v55 = vrot.slane %v2107_v40, 2  ;;  %v697_v56 = vrot.slane %v2161_v61, 2  ;;  %v700_v61 = vrot.slane %v2039_v13, 2 }
  0x29   : > { %v2265_v17 = vsel %vm668_vm3, %v684_v45, %v685_v46  ;;  %v2302_v53 = vsel %vm668_vm3, %v690_v50, %v692_v52  ;;  %v702_v3 = vrot.slane %v2070_v26, 2  ;;  %v2375_v26 = vld [vmem:[%s2368_s16 + $0x8] sm:$0xff]  ;;  %v704_v25 = vrot.slane %v2114_v42, 2 }
  0x2a   : > { %v2315_v20 = vsel %vm668_vm3, %v694_v54, %v695_v55  ;;  %v2327_v60 = vsel %vm668_vm3, %v695_v55, %v697_v56  ;;  %v921_v32 = vrot.slane %v2375_v26, 1 }
  0x2b   : > { %v2361_v16 = vsel %vm668_vm3, %v700_v61, %v702_v3 }
  0x2c   : > { %1664 = vmatmul.msk.f32.gmra.mxu1 %vm466_vm2, %v2149_v57 }
  0x2d   : > { %1668 = vmatmul.msk.f32.gmra.mxu2 %vm466_vm2, %v2152_v58  ;;  %1672 = vmatmul.msk.f32.gmra.mxu3 %vm466_vm2, %v2155_v59 }
  0x2f   : > { %1660 = vmatmul.msk.f32.gmra.mxu0 %vm466_vm2, %v431_v63 }
  0x34   : > { %1665 = vmatmul.msk.f32.gmra.mxu1 %vm466_vm2, %v2183_v8 }
  0x35   : > { %1669 = vmatmul.msk.f32.gmra.mxu2 %vm466_vm2, %v2186_v9  ;;  %1673 = vmatmul.msk.f32.gmra.mxu3 %vm466_vm2, %v2189_v11 }
  0x37   : > { %1661 = vmatmul.msk.f32.gmra.mxu0 %vm466_vm2, %v433_v14 }
  0x3c   : > { %1675 = vmatmul.msk.f32.vlgmr.msrb.gmra.mxu1 %vm466_vm2, %v2048_v18  ;;  %v675_v18 = vrot.slane %v2135_v49, 2 }
  0x3d   : > { %1693 = vmatmul.msk.f32.vlgmr.msrb.gmra.mxu2 %vm466_vm2, %v671_v22  ;;  %1711 = vmatmul.msk.f32.vlgmr.msrb.gmra.mxu3 %vm466_vm2, %v371_v48 }
  0x3e   : > { %v2217_v30 = vsel %vm668_vm3, %v674_v29, %v675_v18  ;;  %v2380_v29 = vld [vmem:[%s2368_s16] sm:$0xff] }
  0x3f   : > { %1729 = vmatmul.msk.f32.vlgmr.msrb.gmra.mxu0 %vm466_vm2, %v431_v63  ;;  %v699_v63 = vrot.slane %v2036_v12, 2  ;;  %v920_v31 = vrot.slane %v2380_v29, 1 }
  0x44   : > { %1676 = vmatmul.msk.f32.gmra.mxu1 %vm466_vm2, %v2057_v21  ;;  %v677_v21 = vrot.slane %v373_v1, 2  ;;  %v2342_v1 = vsel %vm668_vm3, %v699_v63, %v700_v61 }
  0x45   : > { %1694 = vmatmul.msk.f32.gmra.mxu2 %vm466_vm2, %v673_v27  ;;  %1712 = vmatmul.msk.f32.gmra.mxu3 %vm466_vm2, %v2135_v49  ;;  %v705_v27 = vrot.slane %v2117_v43, 2 }
  0x46   : > { %v2227_v28 = vsel %vm668_vm3, %v675_v18, %v677_v21 }
  0x47   : > { %1730 = vmatmul.msk.f32.gmra.mxu0 %vm466_vm2, %v433_v14  ;;  %v2393_v45 = vsel %vm668_vm3, %v704_v25, %v705_v27 }
  0x4c   : > { %1677 = vmatmul.msk.f32.gmra.mxu1 %vm466_vm2, %v371_v48  ;;  %v2277_v48 = vsel %vm668_vm3, %v685_v46, %v687_v47  ;;  %v2398_v47 = vsel %vm423_vm1, %v920_v31, %v921_v32 }
  0x4d   : > { %1695 = vmatmul.msk.f32.gmra.mxu2 %vm466_vm2, %v2217_v30  ;;  %1713 = vmatmul.msk.f32.gmra.mxu3 %vm466_vm2, %v2021_v5 }
  0x4f   : > { %1731 = vmatmul.msk.f32.gmra.mxu0 %vm466_vm2, %v2051_v19 }
  0x54   : > { %1678 = vmatmul.msk.f32.gmra.mxu1 %vm466_vm2, %v2135_v49  ;;  %v689_v49 = vrot.slane %v2027_v7, 2 }
  0x55   : > { %1696 = vmatmul.msk.f32.gmra.mxu2 %vm466_vm2, %v2227_v28  ;;  %1714 = vmatmul.msk.f32.gmra.mxu3 %vm466_vm2, %v2024_v6 }
  0x56   : > { %v2290_v51 = vsel %vm668_vm3, %v689_v49, %v690_v50  ;;  %v2405_v49 = vld [vmem:[%s2368_s16 + $0x10] sm:$0x3]  ;;  %v707_v50 = vrot.slane %v2164_v62, 2 }
  0x57   : > { %1732 = vmatmul.msk.f32.gmra.mxu0 %vm466_vm2, %v2086_v33  ;;  %v923_v55 = vrot.slane %v2405_v49, 1 }
  0x58   : > { %v2418_v63 = vsel %vm668_vm3, %v705_v27, %v707_v50 }
  0x59   : > { %v2423_v62 = vsel %vm423_vm1, %v921_v32, %v923_v55 }
  0x5a   : > { %2701 = vst [vmem:[#allocation4_spill] sm:$0xff] %v2423_v62 }
  0x5c   : > { %1679 = vmatmul.msk.f32.gmra.mxu1 %vm466_vm2, %v2021_v5 }
  0x5d   : > { %1697 = vmatmul.msk.f32.gmra.mxu2 %vm466_vm2, %v2240_v36  ;;  %1715 = vmatmul.msk.f32.gmra.mxu3 %vm466_vm2, %v2089_v34 }
  0x5f   : > { %1733 = vmatmul.msk.f32.gmra.mxu0 %vm466_vm2, %v2149_v57 }
  0x64   : > { %1680 = vmatmul.msk.f32.gmra.mxu1 %vm466_vm2, %v2024_v6 }
  0x65   : > { %1698 = vmatmul.msk.f32.gmra.mxu2 %vm466_vm2, %v2252_v44  ;;  %1716 = vmatmul.msk.f32.gmra.mxu3 %vm466_vm2, %v2092_v35 }
  0x67   : > { %1734 = vmatmul.msk.f32.gmra.mxu0 %vm466_vm2, %v2183_v8 }
  0x6c   : > { %1681 = vmatmul.msk.f32.gmra.mxu1 %vm466_vm2, %v2089_v34 }
  0x6d   : > { %1699 = vmatmul.msk.f32.gmra.mxu2 %vm466_vm2, %v2265_v17  ;;  %1717 = vmatmul.msk.f32.gmra.mxu3 %vm466_vm2, %v2027_v7 }
  0x6f   : > { %1735 = vmatmul.msk.f32.gmra.mxu0 %vm466_vm2, %v2063_v23 }
  0x74   : > { %1682 = vmatmul.msk.f32.gmra.mxu1 %vm466_vm2, %v2092_v35 }
  0x75   : > { %1700 = vmatmul.msk.f32.gmra.mxu2 %vm466_vm2, %v2277_v48  ;;  %1718 = vmatmul.msk.f32.gmra.mxu3 %vm466_vm2, %v2032_v10 }
  0x77   : > { %1736 = vmatmul.msk.f32.gmra.mxu0 %vm466_vm2, %v2098_v37 }
  0x7c   : > { %1683 = vmatmul.msk.f32.gmra.mxu1 %vm466_vm2, %v2027_v7 }
  0x7d   : > { %1701 = vmatmul.msk.f32.gmra.mxu2 %vm466_vm2, %v2290_v51  ;;  %1719 = vmatmul.msk.f32.gmra.mxu3 %vm466_vm2, %v2104_v39 }
  0x7f   : > { %1737 = vmatmul.msk.f32.gmra.mxu0 %vm466_vm2, %v2152_v58 }
  0x84   : > { %1684 = vmatmul.msk.f32.gmra.mxu1 %vm466_vm2, %v2032_v10 }
  0x85   : > { %1702 = vmatmul.msk.f32.gmra.mxu2 %vm466_vm2, %v2302_v53  ;;  %1720 = vmatmul.msk.f32.gmra.mxu3 %vm466_vm2, %v2107_v40 }
  0x87   : > { %1738 = vmatmul.msk.f32.gmra.mxu0 %vm466_vm2, %v2186_v9 }
  0x8c   : > { %1685 = vmatmul.msk.f32.gmra.mxu1 %vm466_vm2, %v2104_v39 }
  0x8d   : > { %1703 = vmatmul.msk.f32.gmra.mxu2 %vm466_vm2, %v2315_v20  ;;  %1721 = vmatmul.msk.f32.gmra.mxu3 %vm466_vm2, %v2036_v12 }
  0x8f   : > { %1739 = vmatmul.msk.f32.gmra.mxu0 %vm466_vm2, %v2066_v24 }
  0x94   : > { %1686 = vmatmul.msk.f32.gmra.mxu1 %vm466_vm2, %v2107_v40 }
  0x95   : > { %1704 = vmatmul.msk.f32.gmra.mxu2 %vm466_vm2, %v2327_v60  ;;  %1722 = vmatmul.msk.f32.gmra.mxu3 %vm466_vm2, %v2039_v13 }
  0x97   : > { %1740 = vmatmul.msk.f32.gmra.mxu0 %vm466_vm2, %v2101_v38 }
  0x99   : > { %v2339_v0 = vpop.f32.mrf.mxu1 }
  0x9c   : > { %1687 = vmatmul.msk.f32.gmra.mxu1 %vm466_vm2, %v2036_v12  ;;  %v520_v2 = vpop.f32.mrf.mxu0 }
  0x9d   : > { %1705 = vmatmul.msk.f32.gmra.mxu2 %vm466_vm2, %v2342_v1  ;;  %1723 = vmatmul.msk.f32.gmra.mxu3 %vm466_vm2, %v2114_v42 }
  0x9f   : > { %1741 = vmatmul.msk.f32.gmra.mxu0 %vm466_vm2, %v2155_v59 }
  0xa0   : > { %v2353_v4 = vpop.f32.mrf.mxu2  ;;  %v2355_v14 = vpop.f32.mrf.mxu3 }
  0xa1   : > { %v2357_v15 = vpop.f32.mrf.mxu1 }
  0xa4   : > { %1688 = vmatmul.msk.f32.gmra.mxu1 %vm466_vm2, %v2039_v13  ;;  %v523_v22 = vpop.f32.mrf.mxu0 }
  0xa5   : > { %1706 = vmatmul.msk.f32.gmra.mxu2 %vm466_vm2, %v2361_v16  ;;  %1724 = vmatmul.msk.f32.gmra.mxu3 %vm466_vm2, %v2117_v43 }
  0xa7   : > { %1742 = vmatmul.msk.f32.gmra.mxu0 %vm466_vm2, %v2189_v11 }
  0xa8   : > { %v2384_v18 = vpop.f32.mrf.mxu2  ;;  %v2386_v21 = vpop.f32.mrf.mxu3 }
  0xa9   : > { %2699 = vst [vmem:[#allocation2_spill] sm:$0xff] %v2386_v21  ;;  %v2390_v41 = vpop.f32.mrf.mxu1 }
  0xac   : > { %1689 = vmatmul.msk.f32.gmra.mxu1 %vm466_vm2, %v2114_v42  ;;  %v526_v46 = vpop.f32.mrf.mxu0 }
  0xad   : > { %1707 = vmatmul.msk.f32.gmra.mxu2 %vm466_vm2, %v2393_v45  ;;  %1725 = vmatmul.msk.f32.gmra.mxu3 %vm466_vm2, %v2380_v29 }
  0xaf   : > { %1743 = vmatmul.msk.f32.gmra.mxu0 %vm466_vm2, %v2398_v47 }
  0xb0   : > { %v2410_v52 = vpop.f32.mrf.mxu2  ;;  %v2412_v54 = vpop.f32.mrf.mxu3 }
  0xb1   : > { %2700 = vst [vmem:[#allocation3_spill] sm:$0xff] %v2412_v54  ;;  %v2415_v56 = vpop.f32.mrf.mxu1 }
  0xb4   : > { %1690 = vmatmul.msk.f32.gmra.mxu1 %vm466_vm2, %v2117_v43  ;;  %v529_v61 = vpop.f32.mrf.mxu0 }
  0xb5   : > { %1708 = vmatmul.msk.f32.gmra.mxu2 %vm466_vm2, %v2418_v63  ;;  %1726 = vmatmul.msk.f32.gmra.mxu3 %vm466_vm2, %v2375_v26 }
  0xb7   : > { %1744 = vmatmul.msk.f32.gmra.mxu0 %vm466_vm2, %v2423_v62 }
  0xb8   : > { %v2431_v3 = vpop.f32.mrf.mxu2  ;;  %v2433_v25 = vpop.f32.mrf.mxu3 }
  0xb9   : > { %2702 = vst [vmem:[#allocation5_spill] sm:$0xff] %v2433_v25  ;;  %v620_v27 = vpop.f32.mrf.mxu1 }
  0xba   : > { %v621_v32 = vadd.f32 %v620_v27, %v520_v2 }
  0xbc   : > { %1747 = vmatmul.msk.f32.vlgmr.msra.gmra.mxu1 %vm466_vm2, %v2217_v30  ;;  %v951_v31 = vpop.f32.mrf.mxu0 }
  0xbd   : > { %1765 = vmatmul.msk.f32.vlgmr.msra.gmra.mxu2 %vm466_vm2, %v2021_v5  ;;  %1783 = vmatmul.msk.f32.vlgmr.msra.gmra.mxu3 %vm466_vm2, %v2051_v19 }
  0xbf   : > { %1801 = vmatmul.msk.f32.vlgmr.msra.gmra.mxu0 %vm466_vm2, %v2240_v36 }
  0xc0   : > { %v763_v50 = vpop.f32.mrf.mxu2  ;;  %v855_v55 = vpop.f32.mrf.mxu3 }
  0xc1   : > { %v811_v54 = vadd.f32 %v763_v50, %v621_v32  ;;  %v623_v21 = vpop.f32.mrf.mxu1 }
  0xc2   : > { %v624_v5 = vadd.f32 %v623_v21, %v523_v22 }
  0xc3   : > { %v903_v25 = vadd.f32 %v855_v55, %v811_v54 }
  0xc4   : > { %1748 = vmatmul.msk.f32.gmra.mxu1 %vm466_vm2, %v2227_v28  ;;  %v954_v30 = vpop.f32.mrf.mxu0 }
  0xc5   : > { %v2445_v62 = vadd.f32 %v951_v31, %v903_v25  ;;  %1766 = vmatmul.msk.f32.gmra.mxu2 %vm466_vm2, %v2024_v6  ;;  %1784 = vmatmul.msk.f32.gmra.mxu3 %vm466_vm2, %v2086_v33 }
  0xc7   : > { %1802 = vmatmul.msk.f32.gmra.mxu0 %vm466_vm2, %v2252_v44 }
  0xc8   : > { %v766_v19 = vpop.f32.mrf.mxu2  ;;  %v858_v2 = vpop.f32.mrf.mxu3 }
  0xc9   : > { %v812_v27 = vadd.f32 %v766_v19, %v624_v5  ;;  %v626_v54 = vpop.f32.mrf.mxu1 }
  0xca   : > { %v627_v6 = vadd.f32 %v626_v54, %v526_v46 }
  0xcb   : > { %v904_v32 = vadd.f32 %v858_v2, %v812_v27 }
  0xcc   : > { %1749 = vmatmul.msk.f32.gmra.mxu1 %vm466_vm2, %v2240_v36  ;;  %v957_v28 = vpop.f32.mrf.mxu0 }
  0xcd   : > { %v2455_v25 = vadd.f32 %v954_v30, %v904_v32  ;;  %1767 = vmatmul.msk.f32.gmra.mxu2 %vm466_vm2, %v2089_v34  ;;  %1785 = vmatmul.msk.f32.gmra.mxu3 %vm466_vm2, %v2149_v57 }
  0xcf   : > { %1803 = vmatmul.msk.f32.gmra.mxu0 %vm466_vm2, %v2265_v17 }
  0xd0   : > { %v769_v33 = vpop.f32.mrf.mxu2  ;;  %v861_v22 = vpop.f32.mrf.mxu3 }
  0xd1   : > { %v813_v21 = vadd.f32 %v769_v33, %v627_v6  ;;  %v629_v31 = vpop.f32.mrf.mxu1 }
  0xd2   : > { %v630_v34 = vadd.f32 %v629_v31, %v529_v61 }
  0xd3   : > { %v905_v50 = vadd.f32 %v861_v22, %v813_v21 }
  0xd4   : > { %1750 = vmatmul.msk.f32.gmra.mxu1 %vm466_vm2, %v2252_v44  ;;  %v960_v36 = vpop.f32.mrf.mxu0 }
  0xd5   : > { %v2465_v55 = vadd.f32 %v957_v28, %v905_v50  ;;  %1768 = vmatmul.msk.f32.gmra.mxu2 %vm466_vm2, %v2092_v35  ;;  %1786 = vmatmul.msk.f32.gmra.mxu3 %vm466_vm2, %v2183_v8 }
  0xd7   : > { %1804 = vmatmul.msk.f32.gmra.mxu0 %vm466_vm2, %v2277_v48 }
  0xd8   : > { %v772_v57 = vpop.f32.mrf.mxu2  ;;  %v864_v46 = vpop.f32.mrf.mxu3 }
  0xd9   : > { %v814_v30 = vadd.f32 %v772_v57, %v630_v34  ;;  %v632_v5 = vpop.f32.mrf.mxu1 }
  0xda   : > { %v633_v35 = vadd.f32 %v632_v5, %v2339_v0 }
  0xdb   : > { %v906_v19 = vadd.f32 %v864_v46, %v814_v30 }
  0xdc   : > { %1751 = vmatmul.msk.f32.gmra.mxu1 %vm466_vm2, %v2265_v17  ;;  %v963_v44 = vpop.f32.mrf.mxu0 }
  0xdd   : > { %v2475_v2 = vadd.f32 %v960_v36, %v906_v19  ;;  %1769 = vmatmul.msk.f32.gmra.mxu2 %vm466_vm2, %v2027_v7  ;;  %1787 = vmatmul.msk.f32.gmra.mxu3 %vm466_vm2, %v2063_v23 }
  0xdf   : > { %1805 = vmatmul.msk.f32.gmra.mxu0 %vm466_vm2, %v2290_v51 }
  0xe0   : > { %v775_v8 = vpop.f32.mrf.mxu2  ;;  %v867_v61 = vpop.f32.mrf.mxu3 }
  0xe1   : > { %v815_v27 = vadd.f32 %v775_v8, %v633_v35  ;;  %v635_v54 = vpop.f32.mrf.mxu1 }
  0xe2   : > { %v636_v7 = vadd.f32 %v635_v54, %v2357_v15 }
  0xe3   : > { %v907_v32 = vadd.f32 %v867_v61, %v815_v27 }
  0xe4   : > { %1752 = vmatmul.msk.f32.gmra.mxu1 %vm466_vm2, %v2277_v48  ;;  %v966_v17 = vpop.f32.mrf.mxu0 }
  0xe5   : > { %v2486_v28 = vadd.f32 %v963_v44, %v907_v32  ;;  %1770 = vmatmul.msk.f32.gmra.mxu2 %vm466_vm2, %v2032_v10  ;;  %1788 = vmatmul.msk.f32.gmra.mxu3 %vm466_vm2, %v2098_v37 }
  0xe7   : > { %1806 = vmatmul.msk.f32.gmra.mxu0 %vm466_vm2, %v2302_v53 }
  0xe8   : > { %v778_v23 = vpop.f32.mrf.mxu2  ;;  %v870_v0 = vpop.f32.mrf.mxu3 }
  0xe9   : > { %v816_v6 = vadd.f32 %v778_v23, %v636_v7  ;;  %v638_v33 = vpop.f32.mrf.mxu1 }
  0xea   : > { %v639_v10 = vadd.f32 %v638_v33, %v2390_v41 }
  0xeb   : > { %v908_v22 = vadd.f32 %v870_v0, %v816_v6 }
  0xec   : > { %1753 = vmatmul.msk.f32.gmra.mxu1 %vm466_vm2, %v2290_v51  ;;  %v969_v48 = vpop.f32.mrf.mxu0 }
  0xed   : > { %v2497_v21 = vadd.f32 %v966_v17, %v908_v22  ;;  %1771 = vmatmul.msk.f32.gmra.mxu2 %vm466_vm2, %v2104_v39  ;;  %1789 = vmatmul.msk.f32.gmra.mxu3 %vm466_vm2, %v2152_v58 }
  0xef   : > { %1807 = vmatmul.msk.f32.gmra.mxu0 %vm466_vm2, %v2315_v20 }
  0xf0   : > { %v781_v37 = vpop.f32.mrf.mxu2  ;;  %v873_v15 = vpop.f32.mrf.mxu3 }
  0xf1   : > { %v817_v31 = vadd.f32 %v781_v37, %v639_v10  ;;  %v641_v50 = vpop.f32.mrf.mxu1 }
  0xf2   : > { %v642_v39 = vadd.f32 %v641_v50, %v2415_v56 }
  0xf3   : > { %v909_v36 = vadd.f32 %v873_v15, %v817_v31  ;;  %v1018_v31 = vrot.slane %v2405_v49, 2 }
  0xf4   : > { %1754 = vmatmul.msk.f32.gmra.mxu1 %vm466_vm2, %v2302_v53  ;;  %v972_v51 = vpop.f32.mrf.mxu0 }
  0xf5   : > { %v2508_v34 = vadd.f32 %v969_v48, %v909_v36  ;;  %1772 = vmatmul.msk.f32.gmra.mxu2 %vm466_vm2, %v2107_v40  ;;  %1790 = vmatmul.msk.f32.gmra.mxu3 %vm466_vm2, %v2186_v9 }
  0xf7   : > { %1808 = vmatmul.msk.f32.gmra.mxu0 %vm466_vm2, %v2327_v60 }
  0xf8   : > { %v784_v58 = vpop.f32.mrf.mxu2  ;;  %v876_v41 = vpop.f32.mrf.mxu3 }
  0xf9   : > { %v818_v57 = vadd.f32 %v784_v58, %v642_v39  ;;  %v644_v46 = vpop.f32.mrf.mxu1  ;;  %v396_v39 = vld [vmem:[%s2368_s16 + $0x20] sm:$0xff] }
  0xfa   : > { %v645_v40 = vadd.f32 %v644_v46, %v2353_v4 }
  0xfb   : > { %v910_v30 = vadd.f32 %v876_v41, %v818_v57  ;;  %v1204_v41 = vrot.slane %v396_v39, 1  ;;  %v2704_v57 = vld [vmem:[#allocation2_spill] sm:$0xff] }
  0xfc   : > { %1755 = vmatmul.msk.f32.gmra.mxu1 %vm466_vm2, %v2315_v20  ;;  %v975_v53 = vpop.f32.mrf.mxu0 }
  0xfd   : > { %v2519_v5 = vadd.f32 %v972_v51, %v910_v30  ;;  %1773 = vmatmul.msk.f32.gmra.mxu2 %vm466_vm2, %v2036_v12  ;;  %1791 = vmatmul.msk.f32.gmra.mxu3 %vm466_vm2, %v2066_v24  ;;  %v395_v51 = vld [vmem:[%s2368_s16 + $0x18] sm:$0xff] }
  0xfe   : > { %v1203_v49 = vrot.slane %v395_v51, 1 }
  0xff   : > { %1809 = vmatmul.msk.f32.gmra.mxu0 %vm466_vm2, %v2342_v1 }
 0x100   : > { %v787_v9 = vpop.f32.mrf.mxu2  ;;  %v879_v56 = vpop.f32.mrf.mxu3 }
 0x101   : > { %v819_v19 = vadd.f32 %v787_v9, %v645_v40  ;;  %v647_v44 = vpop.f32.mrf.mxu1  ;;  %v1299_v40 = vrot.slane %v396_v39, 2 }
 0x102   : > { %v648_v12 = vadd.f32 %v647_v44, %v2384_v18 }
 0x103   : > { %v911_v35 = vadd.f32 %v879_v56, %v819_v19  ;;  %v1205_v19 = vsel %vm423_vm1, %v1203_v49, %v1204_v41 }
 0x104   : > { %1756 = vmatmul.msk.f32.gmra.mxu1 %vm466_vm2, %v2327_v60  ;;  %v978_v20 = vpop.f32.mrf.mxu0 }
 0x105   : > { %v2530_v8 = vadd.f32 %v975_v53, %v911_v35  ;;  %1774 = vmatmul.msk.f32.gmra.mxu2 %vm466_vm2, %v2039_v13  ;;  %1792 = vmatmul.msk.f32.gmra.mxu3 %vm466_vm2, %v2101_v38  ;;  %v1298_v53 = vrot.slane %v395_v51, 2  ;;  %v397_v35 = vld [vmem:[%s2368_s16 + $0x28] sm:$0x3] }
 0x107   : > { %1810 = vmatmul.msk.f32.gmra.mxu0 %vm466_vm2, %v2361_v16 }
 0x108   : > { %v790_v24 = vpop.f32.mrf.mxu2  ;;  %v882_v4 = vpop.f32.mrf.mxu3 }
 0x109   : > { %v820_v61 = vadd.f32 %v790_v24, %v648_v12  ;;  %v650_v27 = vpop.f32.mrf.mxu1  ;;  %v1206_v24 = vrot.slane %v397_v35, 1 }
 0x10a   : > { %v651_v13 = vadd.f32 %v650_v27, %v2410_v52  ;;  %v1016_v52 = vrot.slane %v2375_v26, 2 }
 0x10b   : > { %v912_v54 = vadd.f32 %v882_v4, %v820_v61  ;;  %v2705_v4 = vld [vmem:[#allocation3_spill] sm:$0xff] }
 0x10c   : > { %1757 = vmatmul.msk.f32.gmra.mxu1 %vm466_vm2, %v2342_v1  ;;  %v981_v60 = vpop.f32.mrf.mxu0  ;;  %v1019_v58 = vsel %vm668_vm3, %v1016_v52, %v1018_v31 }
 0x10d   : > { %v2541_v32 = vadd.f32 %v978_v20, %v912_v54  ;;  %1775 = vmatmul.msk.f32.gmra.mxu2 %vm466_vm2, %v2114_v42  ;;  %1793 = vmatmul.msk.f32.gmra.mxu3 %vm466_vm2, %v2155_v59  ;;  %v1015_v59 = vrot.slane %v2380_v29, 2  ;;  %v1300_v20 = vsel %vm668_vm3, %v1298_v53, %v1299_v40 }
 0x10f   : > { %1811 = vmatmul.msk.f32.gmra.mxu0 %vm466_vm2, %v2393_v45 }
 0x110   : > { %v793_v38 = vpop.f32.mrf.mxu2  ;;  %v885_v18 = vpop.f32.mrf.mxu3 }
 0x111   : > { %v821_v17 = vadd.f32 %v793_v38, %v651_v13  ;;  %v653_v7 = vpop.f32.mrf.mxu1 }
 0x112   : > { %v654_v42 = vadd.f32 %v653_v7, %v2431_v3 }
 0x113   : > { %v913_v23 = vadd.f32 %v885_v18, %v821_v17  ;;  %v1207_v18 = vsel %vm423_vm1, %v1204_v41, %v1206_v24 }
 0x114   : > { %1758 = vmatmul.msk.f32.gmra.mxu1 %vm466_vm2, %v2361_v16  ;;  %v984_v1 = vpop.f32.mrf.mxu0 }
 0x115   : > { %v2552_v0 = vadd.f32 %v981_v60, %v913_v23  ;;  %1776 = vmatmul.msk.f32.gmra.mxu2 %vm466_vm2, %v2117_v43  ;;  %1794 = vmatmul.msk.f32.gmra.mxu3 %vm466_vm2, %v2189_v11  ;;  %v1017_v11 = vsel %vm668_vm3, %v1015_v59, %v1016_v52  ;;  %v1301_v60 = vrot.slane %v397_v35, 2 }
 0x117   : > { %1812 = vmatmul.msk.f32.gmra.mxu0 %vm466_vm2, %v2418_v63  ;;  %v1302_v23 = vsel %vm668_vm3, %v1299_v40, %v1301_v60 }
 0x118   : > { %v796_v6 = vpop.f32.mrf.mxu2  ;;  %v888_v16 = vpop.f32.mrf.mxu3 }
 0x119   : > { %v822_v33 = vadd.f32 %v796_v6, %v654_v42  ;;  %v656_v22 = vpop.f32.mrf.mxu1  ;;  %v2706_v42 = vld [vmem:[#allocation5_spill] sm:$0xff] }
 0x11a   : > { %v657_v10 = vadd.f32 %v656_v22, %v2355_v14  ;;  %v2703_v14 = vld [vmem:[#allocation4_spill] sm:$0xff] }
 0x11b   : > { %v914_v48 = vadd.f32 %v888_v16, %v822_v33 }
 0x11c   : > { %1759 = vmatmul.msk.f32.gmra.mxu1 %vm466_vm2, %v2393_v45  ;;  %v987_v43 = vpop.f32.mrf.mxu0 }
 0x11d   : > { %v2566_v3 = vadd.f32 %v984_v1, %v914_v48  ;;  %1777 = vmatmul.msk.f32.gmra.mxu2 %vm466_vm2, %v2380_v29  ;;  %1795 = vmatmul.msk.f32.gmra.mxu3 %vm466_vm2, %v2398_v47 }
 0x11f   : > { %1813 = vmatmul.msk.f32.gmra.mxu0 %vm466_vm2, %v1017_v11 }
 0x120   : > { %v799_v37 = vpop.f32.mrf.mxu2  ;;  %v891_v15 = vpop.f32.mrf.mxu3 }
 0x121   : > { %v823_v45 = vadd.f32 %v799_v37, %v657_v10  ;;  %v659_v50 = vpop.f32.mrf.mxu1 }
 0x122   : > { %v660_v46 = vadd.f32 %v659_v50, %v2704_v57  ;;  %v2618_v50 = vld [vmem:[%s2695_s3] ss:$0 sm:$0xff] }
 0x123   : > { %v915_v36 = vadd.f32 %v891_v15, %v823_v45 }
 0x124   : > { %1760 = vmatmul.msk.f32.gmra.mxu1 %vm466_vm2, %v2418_v63  ;;  %v990_v29 = vpop.f32.mrf.mxu0 }
 0x125   : > { %v2580_v47 = vadd.f32 %v987_v43, %v915_v36  ;;  %1778 = vmatmul.msk.f32.gmra.mxu2 %vm466_vm2, %v2375_v26  ;;  %1796 = vmatmul.msk.f32.gmra.mxu3 %vm466_vm2, %v2703_v14 }
 0x127   : > { %1814 = vmatmul.msk.f32.gmra.mxu0 %vm466_vm2, %v1019_v58 }
 0x128   : > { %v802_v30 = vpop.f32.mrf.mxu2  ;;  %v894_v63 = vpop.f32.mrf.mxu3 }
 0x129   : > { %v824_v9 = vadd.f32 %v802_v30, %v660_v46  ;;  %v662_v56 = vpop.f32.mrf.mxu1 }
 0x12a   : > { %v663_v61 = vadd.f32 %v662_v56, %v2705_v4 }
 0x12b   : > { %v916_v44 = vadd.f32 %v894_v63, %v824_v9 }
 0x12c   : > { %1761 = vmatmul.msk.f32.gmra.mxu1 %vm466_vm2, %v1017_v11  ;;  %v993_v26 = vpop.f32.mrf.mxu0 }
 0x12d   : > { %v2592_v12 = vadd.f32 %v990_v29, %v916_v44  ;;  %1779 = vmatmul.msk.f32.gmra.mxu2 %vm466_vm2, %v395_v51  ;;  %1797 = vmatmul.msk.f32.gmra.mxu3 %vm466_vm2, %v1205_v19 }
 0x12f   : > { %1815 = vmatmul.msk.f32.gmra.mxu0 %vm466_vm2, %v1300_v20 }
 0x130   : > { %v805_v27 = vpop.f32.mrf.mxu2  ;;  %v897_v54 = vpop.f32.mrf.mxu3 }
 0x131   : > { %v825_v13 = vadd.f32 %v805_v27, %v663_v61  ;;  %v665_v38 = vpop.f32.mrf.mxu1 }
 0x132   : > { %v666_v59 = vadd.f32 %v665_v38, %v2706_v42 }
 0x133   : > { %v917_v17 = vadd.f32 %v897_v54, %v825_v13 }
 0x134   : > { %1762 = vmatmul.msk.f32.gmra.mxu1 %vm466_vm2, %v1019_v58  ;;  %v996_v7 = vpop.f32.mrf.mxu0 }
 0x135   : > { %v2602_v1 = vadd.f32 %v993_v26, %v917_v17  ;;  %1780 = vmatmul.msk.f32.gmra.mxu2 %vm466_vm2, %v396_v39  ;;  %1798 = vmatmul.msk.f32.gmra.mxu3 %vm466_vm2, %v1207_v18 }
 0x137   : > { %1816 = vmatmul.msk.f32.gmra.mxu0 %vm466_vm2, %v1302_v23 }
 0x138   : > { %v808_v52 = vpop.f32.mrf.mxu2  ;;  %v900_v6 = vpop.f32.mrf.mxu3 }
 0x139   : > { %v826_v16 = vadd.f32 %v808_v52, %v666_v59  ;;  %v1046_v33 = vpop.f32.mrf.mxu1 }
 0x13a   : > { %v1094_v11 = vadd.f32 %v1046_v33, %v2445_v62 }
 0x13b   : > { %v918_v22 = vadd.f32 %v900_v6, %v826_v16 }
 0x13c   : > { %v1329_v48 = vpop.f32.mrf.mxu0 }
 0x13d   : > { %v2612_v43 = vadd.f32 %v996_v7, %v918_v22 }
 0x140   : > { %v1138_v10 = vpop.f32.mrf.mxu2  ;;  %v1234_v37 = vpop.f32.mrf.mxu3 }
 0x141   : > { %v1186_v15 = vadd.f32 %v1138_v10, %v1094_v11  ;;  %v1049_v31 = vpop.f32.mrf.mxu1 }
 0x142   : > { %v1095_v62 = vadd.f32 %v1049_v31, %v2455_v25 }
 0x143   : > { %v1282_v45 = vadd.f32 %v1234_v37, %v1186_v15 }
 0x144   : > { %v1332_v36 = vpop.f32.mrf.mxu0 }
 0x145   : > { %v1377_v51 = vadd.f32 %v1329_v48, %v1282_v45 }
 0x147   : > { %v1397_v39 = vadd.f32 %v2618_v50, %v1377_v51 }
 0x148   : > { %v1141_v29 = vpop.f32.mrf.mxu2  ;;  %v1237_v58 = vpop.f32.mrf.mxu3 }
 0x149   : > { %1413 = vst [vmem:[%s2623_s6] sm:$0xff] %v1397_v39  ;;  %v1187_v14 = vadd.f32 %v1141_v29, %v1095_v62  ;;  %v1052_v49 = vpop.f32.mrf.mxu1  ;;  %v1450_v9 = vmul.f32 %v1397_v39, %v1397_v39 }
 0x14a   : > { %v1096_v30 = vadd.f32 %v1052_v49, %v2465_v55 }
 0x14b   : > { %v1283_v41 = vadd.f32 %v1237_v58, %v1187_v14 }
 0x14c   : > { %v1335_v57 = vpop.f32.mrf.mxu0 }
 0x14d   : > { %v1378_v46 = vadd.f32 %v1332_v36, %v1283_v41 }
 0x14f   : > { %v1398_v63 = vadd.f32 %v2618_v50, %v1378_v46 }
 0x150   : > { %v1144_v53 = vpop.f32.mrf.mxu2  ;;  %v1240_v40 = vpop.f32.mrf.mxu3 }
 0x151   : > { %1414 = vst [vmem:[%s2623_s6 + $0x8] sm:$0xff] %v1398_v63  ;;  %v1429_v25 = vadd.f32 %v1398_v63, %v1397_v39  ;;  %v1451_v56 = vmul.f32 %v1398_v63, %v1398_v63  ;;  %v1188_v19 = vadd.f32 %v1144_v53, %v1096_v30  ;;  %v1055_v44 = vpop.f32.mrf.mxu1 }
 0x152   : > { %v1097_v4 = vadd.f32 %v1055_v44, %v2475_v2 }
 0x153   : > { %v1466_v35 = vadd.f32 %v1451_v56, %v1450_v9  ;;  %v1284_v26 = vadd.f32 %v1240_v40, %v1188_v19 }
 0x154   : > { %v1338_v20 = vpop.f32.mrf.mxu0 }
 0x155   : > { %v1379_v24 = vadd.f32 %v1335_v57, %v1284_v26 }
 0x157   : > { %v1399_v61 = vadd.f32 %v2618_v50, %v1379_v24 }
 0x158   : > { %v1147_v55 = vpop.f32.mrf.mxu2  ;;  %v1243_v27 = vpop.f32.mrf.mxu3 }
 0x159   : > { %1415 = vst [vmem:[%s2623_s6 + $0x10] sm:$0xff] %v1399_v61  ;;  %v1430_v54 = vadd.f32 %v1429_v25, %v1399_v61  ;;  %v1452_v60 = vmul.f32 %v1399_v61, %v1399_v61  ;;  %v1189_v13 = vadd.f32 %v1147_v55, %v1097_v4  ;;  %v1058_v38 = vpop.f32.mrf.mxu1 }
 0x15a   : > { %v1098_v42 = vadd.f32 %v1058_v38, %v2486_v28 }
 0x15b   : > { %v1467_v18 = vadd.f32 %v1466_v35, %v1452_v60  ;;  %v1285_v17 = vadd.f32 %v1243_v27, %v1189_v13 }
 0x15c   : > { %v1341_v7 = vpop.f32.mrf.mxu0 }
 0x15d   : > { %v1380_v23 = vadd.f32 %v1338_v20, %v1285_v17 }
 0x15f   : > { %v1400_v59 = vadd.f32 %v2618_v50, %v1380_v23 }
 0x160   : > { %v1150_v2 = vpop.f32.mrf.mxu2  ;;  %v1246_v52 = vpop.f32.mrf.mxu3 }
 0x161   : > { %1416 = vst [vmem:[%s2623_s6 + $0x18] sm:$0xff] %v1400_v59  ;;  %v1431_v6 = vadd.f32 %v1430_v54, %v1400_v59  ;;  %v1453_v16 = vmul.f32 %v1400_v59, %v1400_v59  ;;  %v1190_v33 = vadd.f32 %v1150_v2, %v1098_v42  ;;  %v1061_v22 = vpop.f32.mrf.mxu1 }
 0x162   : > { %v1099_v15 = vadd.f32 %v1061_v22, %v2497_v21 }
 0x163   : > { %v1468_v48 = vadd.f32 %v1467_v18, %v1453_v16  ;;  %v1286_v11 = vadd.f32 %v1246_v52, %v1190_v33 }
 0x164   : > { %v1344_v10 = vpop.f32.mrf.mxu0 }
 0x165   : > { %v1381_v37 = vadd.f32 %v1341_v7, %v1286_v11 }
 0x167   : > { %v1401_v31 = vadd.f32 %v2618_v50, %v1381_v37 }
 0x168   : > { %v1153_v28 = vpop.f32.mrf.mxu2  ;;  %v1249_v45 = vpop.f32.mrf.mxu3 }
 0x169   : > { %1417 = vst [vmem:[%s2623_s6 + $0x20] sm:$0xff] %v1401_v31  ;;  %v1432_v36 = vadd.f32 %v1431_v6, %v1401_v31  ;;  %v1454_v51 = vmul.f32 %v1401_v31, %v1401_v31  ;;  %v1191_v62 = vadd.f32 %v1153_v28, %v1099_v15  ;;  %v1064_v39 = vpop.f32.mrf.mxu1 }
 0x16a   : > { %v1100_v41 = vadd.f32 %v1064_v39, %v2508_v34 }
 0x16b   : > { %v1469_v29 = vadd.f32 %v1468_v48, %v1454_v51  ;;  %v1287_v58 = vadd.f32 %v1249_v45, %v1191_v62 }
 0x16c   : > { %v1347_v14 = vpop.f32.mrf.mxu0 }
 0x16d   : > { %v1382_v49 = vadd.f32 %v1344_v10, %v1287_v58 }
 0x16f   : > { %v1402_v57 = vadd.f32 %v2618_v50, %v1382_v49 }
 0x170   : > { %v1156_v21 = vpop.f32.mrf.mxu2  ;;  %v1252_v46 = vpop.f32.mrf.mxu3 }
 0x171   : > { %1418 = vst [vmem:[%s2623_s6 + $0x28] sm:$0xff] %v1402_v57  ;;  %v1433_v30 = vadd.f32 %v1432_v36, %v1402_v57  ;;  %v1455_v63 = vmul.f32 %v1402_v57, %v1402_v57  ;;  %v1192_v53 = vadd.f32 %v1156_v21, %v1100_v41  ;;  %v1067_v40 = vpop.f32.mrf.mxu1 }
 0x172   : > { %v1101_v44 = vadd.f32 %v1067_v40, %v2519_v5 }
 0x173   : > { %v1470_v9 = vadd.f32 %v1469_v29, %v1455_v63  ;;  %v1288_v25 = vadd.f32 %v1252_v46, %v1192_v53 }
 0x174   : > { %v1350_v56 = vpop.f32.mrf.mxu0 }
 0x175   : > { %v1383_v19 = vadd.f32 %v1347_v14, %v1288_v25 }
 0x177   : > { %v1403_v35 = vadd.f32 %v2618_v50, %v1383_v19 }
 0x178   : > { %v1159_v34 = vpop.f32.mrf.mxu2  ;;  %v1255_v26 = vpop.f32.mrf.mxu3 }
 0x179   : > { %1419 = vst [vmem:[%s2623_s6 + $0x30] sm:$0xff] %v1403_v35  ;;  %v1434_v20 = vadd.f32 %v1433_v30, %v1403_v35  ;;  %v1456_v24 = vmul.f32 %v1403_v35, %v1403_v35  ;;  %v1193_v4 = vadd.f32 %v1159_v34, %v1101_v44  ;;  %v1070_v61 = vpop.f32.mrf.mxu1 }
 0x17a   : > { %v1102_v13 = vadd.f32 %v1070_v61, %v2530_v8 }
 0x17b   : > { %v1471_v55 = vadd.f32 %v1470_v9, %v1456_v24  ;;  %v1289_v27 = vadd.f32 %v1255_v26, %v1193_v4 }
 0x17c   : > { %v1353_v54 = vpop.f32.mrf.mxu0 }
 0x17d   : > { %v1384_v60 = vadd.f32 %v1350_v56, %v1289_v27 }
 0x17f   : > { %v1404_v38 = vadd.f32 %v2618_v50, %v1384_v60 }
 0x180   : > { %v1162_v5 = vpop.f32.mrf.mxu2  ;;  %v1258_v18 = vpop.f32.mrf.mxu3 }
 0x181   : > { %1420 = vst [vmem:[%s2623_s6 + $0x38] sm:$0xff] %v1404_v38  ;;  %v1435_v17 = vadd.f32 %v1434_v20, %v1404_v38  ;;  %v1457_v7 = vmul.f32 %v1404_v38, %v1404_v38  ;;  %v1194_v23 = vadd.f32 %v1162_v5, %v1102_v13  ;;  %v1073_v42 = vpop.f32.mrf.mxu1 }
 0x182   : > { %v1103_v16 = vadd.f32 %v1073_v42, %v2541_v32 }
 0x183   : > { %v1472_v59 = vadd.f32 %v1471_v55, %v1457_v7  ;;  %v1290_v2 = vadd.f32 %v1258_v18, %v1194_v23 }
 0x184   : > { %v1356_v52 = vpop.f32.mrf.mxu0 }
 0x185   : > { %v1385_v6 = vadd.f32 %v1353_v54, %v1290_v2 }
 0x187   : > { %v1405_v33 = vadd.f32 %v2618_v50, %v1385_v6 }
 0x188   : > { %v1165_v8 = vpop.f32.mrf.mxu2  ;;  %v1261_v22 = vpop.f32.mrf.mxu3 }
 0x189   : > { %1421 = vst [vmem:[%s2623_s6 + $0x40] sm:$0xff] %v1405_v33  ;;  %v1436_v48 = vadd.f32 %v1435_v17, %v1405_v33  ;;  %v1458_v11 = vmul.f32 %v1405_v33, %v1405_v33  ;;  %v1195_v10 = vadd.f32 %v1165_v8, %v1103_v16  ;;  %v1076_v37 = vpop.f32.mrf.mxu1 }
 0x18a   : > { %v1104_v36 = vadd.f32 %v1076_v37, %v2552_v0 }
 0x18b   : > { %v1473_v15 = vadd.f32 %v1472_v59, %v1458_v11  ;;  %v1291_v31 = vadd.f32 %v1261_v22, %v1195_v10 }
 0x18c   : > { %v1359_v28 = vpop.f32.mrf.mxu0 }
 0x18d   : > { %v1386_v45 = vadd.f32 %v1356_v52, %v1291_v31 }
 0x18f   : > { %v1406_v51 = vadd.f32 %v2618_v50, %v1386_v45 }
 0x190   : > { %v1168_v32 = vpop.f32.mrf.mxu2  ;;  %v1264_v62 = vpop.f32.mrf.mxu3 }
 0x191   : > { %1422 = vst [vmem:[%s2623_s6 + $0x48] sm:$0xff] %v1406_v51  ;;  %v1437_v39 = vadd.f32 %v1436_v48, %v1406_v51  ;;  %v1459_v29 = vmul.f32 %v1406_v51, %v1406_v51  ;;  %v1196_v58 = vadd.f32 %v1168_v32, %v1104_v36  ;;  %v1079_v14 = vpop.f32.mrf.mxu1 }
 0x192   : > { %v1105_v46 = vadd.f32 %v1079_v14, %v2566_v3 }
 0x193   : > { %v1474_v49 = vadd.f32 %v1473_v15, %v1459_v29  ;;  %v1292_v41 = vadd.f32 %v1264_v62, %v1196_v58 }
 0x194   : > { %v1362_v57 = vpop.f32.mrf.mxu0 }
 0x195   : > { %v1387_v21 = vadd.f32 %v1359_v28, %v1292_v41 }
 0x197   : > { %v1407_v30 = vadd.f32 %v2618_v50, %v1387_v21 }
 0x198   : > { %v1171_v0 = vpop.f32.mrf.mxu2  ;;  %v1267_v63 = vpop.f32.mrf.mxu3 }
 0x199   : > { %1423 = vst [vmem:[%s2623_s6 + $0x50] sm:$0xff] %v1407_v30  ;;  %v1438_v53 = vadd.f32 %v1437_v39, %v1407_v30  ;;  %v1460_v40 = vmul.f32 %v1407_v30, %v1407_v30  ;;  %v1197_v9 = vadd.f32 %v1171_v0, %v1105_v46  ;;  %v1082_v25 = vpop.f32.mrf.mxu1 }
 0x19a   : > { %v1106_v34 = vadd.f32 %v1082_v25, %v2580_v47 }
 0x19b   : > { %v1475_v56 = vadd.f32 %v1474_v49, %v1460_v40  ;;  %v1293_v19 = vadd.f32 %v1267_v63, %v1197_v9 }
 0x19c   : > { %v1365_v44 = vpop.f32.mrf.mxu0 }
 0x19d   : > { %v1388_v35 = vadd.f32 %v1362_v57, %v1293_v19 }
 0x19f   : > { %v1408_v26 = vadd.f32 %v2618_v50, %v1388_v35 }
 0x1a0   : > { %v1174_v3 = vpop.f32.mrf.mxu2  ;;  %v1270_v20 = vpop.f32.mrf.mxu3 }
 0x1a1   : > { %1424 = vst [vmem:[%s2623_s6 + $0x58] sm:$0xff] %v1408_v26  ;;  %v1439_v24 = vadd.f32 %v1438_v53, %v1408_v26  ;;  %v1461_v4 = vmul.f32 %v1408_v26, %v1408_v26  ;;  %v1198_v61 = vadd.f32 %v1174_v3, %v1106_v34  ;;  %v1085_v55 = vpop.f32.mrf.mxu1 }
 0x1a2   : > { %v1107_v38 = vadd.f32 %v1085_v55, %v2592_v12 }
 0x1a3   : > { %v1476_v27 = vadd.f32 %v1475_v56, %v1461_v4  ;;  %v1294_v54 = vadd.f32 %v1270_v20, %v1198_v61 }
 0x1a4   : > { %v1368_v13 = vpop.f32.mrf.mxu0 }
 0x1a5   : > { %v1389_v60 = vadd.f32 %v1365_v44, %v1294_v54 }
 0x1a7   : > { %v1409_v5 = vadd.f32 %v2618_v50, %v1389_v60 }
 0x1a8   : > { %v1177_v47 = vpop.f32.mrf.mxu2  ;;  %v1273_v18 = vpop.f32.mrf.mxu3 }
 0x1a9   : > { %1425 = vst [vmem:[%s2623_s6 + $0x60] sm:$0xff] %v1409_v5  ;;  %v1440_v17 = vadd.f32 %v1439_v24, %v1409_v5  ;;  %v1462_v7 = vmul.f32 %v1409_v5, %v1409_v5  ;;  %v1199_v23 = vadd.f32 %v1177_v47, %v1107_v38  ;;  %v1088_v42 = vpop.f32.mrf.mxu1 }
 0x1aa   : > { %v1108_v6 = vadd.f32 %v1088_v42, %v2602_v1 }
 0x1ab   : > { %v1477_v59 = vadd.f32 %v1476_v27, %v1462_v7  ;;  %v1295_v2 = vadd.f32 %v1273_v18, %v1199_v23 }
 0x1ac   : > { %v1371_v33 = vpop.f32.mrf.mxu0 }
 0x1ad   : > { %v1390_v52 = vadd.f32 %v1368_v13, %v1295_v2 }
 0x1af   : > { %v1410_v16 = vadd.f32 %v2618_v50, %v1390_v52 }
 0x1b0   : > { %v1180_v12 = vpop.f32.mrf.mxu2  ;;  %v1276_v8 = vpop.f32.mrf.mxu3 }
 0x1b1   : > { %1426 = vst [vmem:[%s2623_s6 + $0x68] sm:$0xff] %v1410_v16  ;;  %v1441_v22 = vadd.f32 %v1440_v17, %v1410_v16  ;;  %v1463_v48 = vmul.f32 %v1410_v16, %v1410_v16  ;;  %v1200_v11 = vadd.f32 %v1180_v12, %v1108_v6  ;;  %v1091_v15 = vpop.f32.mrf.mxu1 }
 0x1b2   : > { %v1109_v28 = vadd.f32 %v1091_v15, %v2612_v43 }
 0x1b3   : > { %v1478_v10 = vadd.f32 %v1477_v59, %v1463_v48  ;;  %v1296_v37 = vadd.f32 %v1276_v8, %v1200_v11 }
 0x1b4   : > { %v1374_v39 = vpop.f32.mrf.mxu0 }
 0x1b5   : > { %v1391_v31 = vadd.f32 %v1371_v33, %v1296_v37 }
 0x1b7   : > { %v1411_v1 = vadd.f32 %v2618_v50, %v1391_v31 }
 0x1b8   : > { %v1183_v45 = vpop.f32.mrf.mxu2  ;;  %v1279_v36 = vpop.f32.mrf.mxu3 }
 0x1b9   : > { %1427 = vst [vmem:[%s2623_s6 + $0x70] sm:$0xff] %v1411_v1  ;;  %v1442_v51 = vadd.f32 %v1441_v22, %v1411_v1  ;;  %v1464_v32 = vmul.f32 %v1411_v1, %v1411_v1  ;;  %v1201_v62 = vadd.f32 %v1183_v45, %v1109_v28 }
 0x1bb   : > { %v1479_v29 = vadd.f32 %v1478_v10, %v1464_v32  ;;  %v1297_v58 = vadd.f32 %v1279_v36, %v1201_v62 }
 0x1bd   : > { %v1392_v14 = vadd.f32 %v1374_v39, %v1297_v58 }
 0x1bf   : > { %v1412_v49 = vadd.f32 %v2618_v50, %v1392_v14 }
 0x1c1   : > { %1428 = vst [vmem:[%s2623_s6 + $0x78] sm:$0xff] %v1412_v49  ;;  %v1443_v41 = vadd.f32 %v1442_v51, %v1412_v49  ;;  %v1465_v57 = vmul.f32 %v1412_v49, %v1412_v49 }
 0x1c3   : > { %v1444_v43 = vrot.slane %v1443_v41, 4  ;;  %v1480_v21 = vadd.f32 %v1479_v29, %v1465_v57 }
 0x1c5   : > { %v1445_v46 = vadd.f32 %v1444_v43, %v1443_v41  ;;  %v1481_v30 = vrot.slane %v1480_v21, 4 }
 0x1c7   : > { %v1446_v0 = vrot.slane %v1445_v46, 2  ;;  %v1482_v63 = vadd.f32 %v1481_v30, %v1480_v21 }
 0x1c9   : > { %v1447_v53 = vadd.f32 %v1446_v0, %v1445_v46  ;;  %v1483_v40 = vrot.slane %v1482_v63, 2 }
 0x1cb   : > { %v1448_v9 = vrot.slane %v1447_v53, 1  ;;  %v1484_v25 = vadd.f32 %v1483_v40, %v1482_v63 }
 0x1cd   : > { %v1449_v56 = vadd.f32 %v1448_v9, %v1447_v53  ;;  %v1485_v19 = vrot.slane %v1484_v25, 1 }
 0x1cf   : > { %v1486_v50 = vadd.f32 %v1485_v19, %v1484_v25  ;;  %v1487_v44 = vperm.slane %v1449_v56, 0 }
 0x1d1   : > { %v1488_v35 = vperm.slane %v1486_v50, 0  ;;  %1489 = vst [vmem:[%s365_s11] sm:$0xff] %v1487_v44 }
 0x1d3   : > { %1490 = vst [vmem:[%s365_s11 + $0x8] sm:$0xff] %v1488_v35 }
 0x1d4 PF: > { %s16_s22 = sadd.s32 1, %s1914_s22   ;;  %s2707_s18 = smov %s1906_s20 }
 0x1d5   : > { %p13_p10 = scmp.ge.s32.totalorder %s16_s22, 6   ;;  %s2708_s19 = smov %s1910_s21 }
 0x1d6   : > { %s2709_s20 = smov %s2712_s23  ;;  %s2710_s21 = smov %s2716_s24 }
 0x1d7   :  { %15 = sbr.rel (!%p13_p10) target bundleno = 3 (0x3), region = 89 }

</bundles_post_ra>
